<compile_context>
chip_gen: v7x
topology: tpu7x:2x2x1
jax: 0.10.0
libtpu: 0.0.40
codegen_flags: <defaults>
</compile_context>

<pallas_src>
import functools
import math

import numpy as np
import jax
import jax.numpy as jnp
from jax.experimental import pallas as pl
from jax.experimental.pallas import tpu as pltpu

BN_EPS = 1e-5


def _round_up(x, m):
    return ((x + m - 1) // m) * m


# ----------------------------------------------------------------------------
# Pallas kernel: tiled bf16 GEMM (optionally batched over a leading axis) with
# fused affine (folded conv-bias + BatchNorm) and ReLU epilogue.
# Grid = (p0, p1, p2, k): (p0,p1,p2) is a size-descending ordering of the
# (batch, M-block, N-block) parallel axes; k is the reduction axis (last).
# ----------------------------------------------------------------------------
def _mm_affine_kernel(a_ref, b_ref, st_ref, o_ref, acc_ref, *, act):
    k = pl.program_id(3)

    @pl.when(k == 0)
    def _():
        acc_ref[...] = jnp.zeros_like(acc_ref)

    acc_ref[...] += jnp.dot(a_ref[0], b_ref[0],
                            preferred_element_type=jnp.float32)

    @pl.when(k == pl.num_programs(3) - 1)
    def _():
        y = acc_ref[...] * st_ref[0:1, :] + st_ref[1:2, :]
        if act == "relu":
            y = jnp.maximum(y, 0.0)
        o_ref[0] = y.astype(o_ref.dtype)


def matmul_affine(a, b, st, act="relu", out_dtype=jnp.bfloat16):
    """out = act((a @ b) * st[0] + st[1]).

    a: (M, K) or (G, M, K) activations (fed to the MXU as bf16).
    b: (K, N) or (G, K, N) weights (pre-cast to bf16 at param-prep time).
    st: (2, N) f32 packed (scale, shift).
    """
    batched = a.ndim == 3
    if not batched:
        a = a[None]
        b = b[None]
    G, M, K = a.shape
    Gb, K2, N = b.shape
    assert K == K2 and Gb == G and st.shape == (2, N)

    # Big tiles: this workload is launch/step-overhead bound, not VMEM bound.
    TM = min(_round_up(M, 16), 1024)
    TK = min(_round_up(K, 128), 2048)
    TN = min(_round_up(N, 128), 512)
    Mp = _round_up(M, TM)
    Kp = _round_up(K, TK)
    Np = _round_up(N, TN)
    # v7x: keep >=2 parallel output blocks on tiny-M / huge-K layers so the
    # second TensorCore is not idle; costs nothing on v5e/v6e.
    if G == 1 and Mp // TM == 1 and Np // TN == 1 and Np >= 256:
        TN = Np // 2

    mb, nb, kb = Mp // TM, Np // TN, Kp // TK

    a_bf = a.astype(jnp.bfloat16)
    b_bf = b.astype(jnp.bfloat16)
    if (Mp, Kp) != (M, K):
        a_bf = jnp.pad(a_bf, ((0, 0), (0, Mp - M), (0, Kp - K)))
    if (Kp, Np) != (K, N):
        b_bf = jnp.pad(b_bf, ((0, 0), (0, Kp - K), (0, Np - N)))
    st_f = st.astype(jnp.float32)
    if Np != N:
        st_f = jnp.pad(st_f, ((0, 0), (0, Np - N)))

    # Put the parallel axis with the most blocks first (megacore utilization).
    order = sorted((("g", G), ("m", mb), ("n", nb)), key=lambda t: -t[1])
    pos = {name: i for i, (name, _) in enumerate(order)}
    grid = (order[0][1], order[1][1], order[2][1], kb)

    def a_map(*ids):
        return (ids[pos["g"]], ids[pos["m"]], ids[3])

    def b_map(*ids):
        return (ids[pos["g"]], ids[3], ids[pos["n"]])

    def st_map(*ids):
        return (0, ids[pos["n"]])

    def o_map(*ids):
        return (ids[pos["g"]], ids[pos["m"]], ids[pos["n"]])

    out = pl.pallas_call(
        functools.partial(_mm_affine_kernel, act=act),
        out_shape=jax.ShapeDtypeStruct((G, Mp, Np), out_dtype),
        grid_spec=pltpu.PrefetchScalarGridSpec(
            num_scalar_prefetch=0,
            grid=grid,
            in_specs=[
                pl.BlockSpec((1, TM, TK), a_map),
                pl.BlockSpec((1, TK, TN), b_map),
                pl.BlockSpec((2, TN), st_map),
            ],
            out_specs=pl.BlockSpec((1, TM, TN), o_map),
            scratch_shapes=[pltpu.VMEM((TM, TN), jnp.float32)],
        ),
        compiler_params=pltpu.CompilerParams(
            dimension_semantics=("parallel", "parallel", "parallel",
                                 "arbitrary"),
            vmem_limit_bytes=48 * 1024 * 1024),
    )(a_bf, b_bf, st_f)
    out = out[:, :M, :N]
    return out if batched else out[0]


# ----------------------------------------------------------------------------
# Conv / Deconv / attention blocks built on the Pallas GEMM kernel.
# ----------------------------------------------------------------------------
def _im2col(x, k, stride, pad):
    """(N,H,W,C) NHWC -> patches (N*Ho*Wo, k*k*C), plus (N, Ho, Wo).

    # TODO(synk): still materializes the k*k-duplicated patch matrix in HBM;
    # fusing the shifted reads into the Pallas GEMM would remove that traffic.
    """
    n, h, w, c = x.shape
    xp = jnp.pad(x, ((0, 0), (pad, pad), (pad, pad), (0, 0))) if pad else x
    ho = (h + 2 * pad - k) // stride + 1
    wo = (w + 2 * pad - k) // stride + 1
    cols = []
    for i in range(k):
        for j in range(k):
            cols.append(xp[:, i:i + stride * (ho - 1) + 1:stride,
                           j:j + stride * (wo - 1) + 1:stride, :])
    patches = jnp.stack(cols, axis=3)                   # (N, Ho, Wo, k*k, C)
    return patches.reshape(n * ho * wo, k * k * c), (n, ho, wo)


def _bn_fold(p):
    sc = p["gamma"] / jnp.sqrt(p["var"] + BN_EPS)       # eval-mode BN
    sh = (p["b"] - p["mean"]) * sc + p["beta"]          # conv bias folded in
    return sc, sh


def _prep_conv(p):
    kh, kw, cin, cout = p["w"].shape
    sc, sh = _bn_fold(p)
    return dict(
        w=p["w"].reshape(kh * kw * cin, cout).astype(jnp.bfloat16),
        st=jnp.stack([sc, sh], axis=0).astype(jnp.float32))


def _prep_deconv(p):
    # ConvTranspose2d(k=4,s=2,p=1) sub-pixel decomposition with the correct
    # spatially FLIPPED kernel: output phase (r, s) uses row taps (3-r, 1-r)
    # and col taps (3-s, 1-s), i.e. flip(w)[r::2, s::2].
    kh, kw, cin, cout = p["w"].shape
    assert kh == 4 and kw == 4
    sc, sh = _bn_fold(p)
    w_flip = p["w"][::-1, ::-1, :, :]
    subs = [w_flip[r::2, s::2, :, :].reshape(4 * cin, cout)
            for r in (0, 1) for s in (0, 1)]
    return dict(
        w=jnp.stack(subs, axis=0).astype(jnp.bfloat16),    # (4, 4*cin, cout)
        st=jnp.stack([sc, sh], axis=0).astype(jnp.float32))


def conv_block(x, prep, k, stride, pad, act="relu"):
    """Conv2d(k, stride, pad) + bias + BN(eval) + ReLU."""
    patches, (n, ho, wo) = _im2col(x, k, stride, pad)
    cout = prep["st"].shape[1]
    y = matmul_affine(patches, prep["w"], prep["st"], act=act)
    return y.reshape(n, ho, wo, cout)


def deconv_block(x, prep, act="relu"):
    """ConvTranspose2d(k=4,s=2,p=1) + bias + BN(eval) + ReLU.

    Sub-pixel decomposition: four 2x2 stride-1 convs on the 1-padded input,
    fused into a SINGLE batched Pallas GEMM (leading grid axis of 4), then
    interleaved into the 2x-upsampled output."""
    n, h, w, cin = x.shape
    cout = prep["st"].shape[1]
    xp = jnp.pad(x, ((0, 0), (1, 1), (1, 1), (0, 0)))
    pats = []
    for r in (0, 1):
        for s in (0, 1):
            win = xp[:, r:r + h + 1, s:s + w + 1, :]
            patch = jnp.stack(
                [win[:, 0:h, 0:w, :], win[:, 0:h, 1:w + 1, :],
                 win[:, 1:h + 1, 0:w, :], win[:, 1:h + 1, 1:w + 1, :]],
                axis=3)                                    # (n, h, w, 4, cin)
            pats.append(patch.reshape(n * h * w, 4 * cin))
    a = jnp.stack(pats, axis=0)                            # (4, M, 4*cin)
    y = matmul_affine(a, prep["w"], prep["st"], act=act)   # (4, M, cout)
    y = y.reshape(2, 2, n, h, w, cout)                     # (r, s, n, h, w, C)
    y = jnp.transpose(y, (2, 3, 0, 4, 1, 5))               # (n, h, r, w, s, C)
    return y.reshape(n, 2 * h, 2 * w, cout)


def asa_attention(x, p):
    # TODO(synk): ASAattention source not provided; SE-style channel attention
    # stand-in. Runs as tiny plain-XLA matmuls (batch=2 would waste an MXU
    # tile in the Pallas GEMM).
    avg = jnp.mean(x.astype(jnp.float32), axis=(1, 2))
    h = jax.nn.relu(avg @ p["w1"] + p["b1"])
    att = jax.nn.sigmoid(h @ p["w2"] + p["b2"])
    return x * att[:, None, None, :].astype(x.dtype)


def _interp_matrix(n_in, n_out):
    """align_corners=True linear-interpolation matrix (n_out, n_in), static."""
    if n_in == 1:
        return np.ones((n_out, 1), np.float32)
    src = np.linspace(0.0, n_in - 1.0, n_out)
    i0 = np.clip(np.floor(src).astype(np.int64), 0, n_in - 2)
    frac = (src - i0).astype(np.float32)
    m = np.zeros((n_out, n_in), np.float32)
    m[np.arange(n_out), i0] = 1.0 - frac
    m[np.arange(n_out), i0 + 1] = frac
    return m


def upsample_bilinear_x2(x):
    """nn.Upsample(scale_factor=2, mode='bilinear', align_corners=True), NHWC.
    Two static interpolation matmuls — no dynamic gather HLOs."""
    n, h, w, c = x.shape
    wy = jnp.asarray(_interp_matrix(h, 2 * h))
    wx = jnp.asarray(_interp_matrix(w, 2 * w))
    y = jnp.einsum("oh,nhwc->nowc", wy, x.astype(jnp.float32))
    return jnp.einsum("pw,nowc->nopc", wx, y)


# ----------------------------------------------------------------------------
# Deterministic parameter construction (synthetic; BN uses eval-mode stats).
# ----------------------------------------------------------------------------
def _conv_params(key, cin, cout, k):
    kw_, kb_ = jax.random.split(key)
    w = jax.random.normal(kw_, (k, k, cin, cout), jnp.float32) / math.sqrt(cin * k * k)
    b = 0.01 * jax.random.normal(kb_, (cout,), jnp.float32)
    ones = jnp.ones((cout,), jnp.float32)
    zeros = jnp.zeros((cout,), jnp.float32)
    return dict(w=w, b=b, gamma=ones, beta=zeros, mean=zeros, var=ones)


def _asa_params(key, c, r=8):
    cr = max(c // r, 1)
    k1, k2 = jax.random.split(key)
    return dict(
        w1=jax.random.normal(k1, (c, cr), jnp.float32) / math.sqrt(c),
        b1=jnp.zeros((cr,), jnp.float32),
        w2=jax.random.normal(k2, (cr, c), jnp.float32) / math.sqrt(cr),
        b2=jnp.zeros((c,), jnp.float32))


_CONV_LAYERS = {
    "SL_1": (3, 32), "SL_2": (32, 64), "SL_3": (64, 128), "SL_4": (128, 256),
    "SL_5": (256, 512), "SR_2": (32, 64), "SR_3": (64, 128),
    "SR_4": (128, 256), "SR_5": (256, 512)}
_DECONV_LAYERS = {
    "SR_1": (3, 32), "cat1": (1024, 512), "cat2": (1024, 256),
    "cat3": (512, 128), "cat4": (256, 64)}
_ASA_LAYERS = {"ASA1": 32, "ASA2": 128, "ASA3": 32, "ASA4": 128,
               "ASA5": 1024, "ASA6": 256}


def build_params(seed=0):
    keys = iter(jax.random.split(jax.random.PRNGKey(seed), 64))
    p = {}
    for name, (ci, co) in _CONV_LAYERS.items():
        p[name] = _conv_params(next(keys), ci, co, 4)
    for name, (ci, co) in _DECONV_LAYERS.items():
        p[name] = _conv_params(next(keys), ci, co, 4)
    p["up_dim"] = _conv_params(next(keys), 3, 32, 1)
    for name, c in _ASA_LAYERS.items():
        p[name] = _asa_params(next(keys), c)
    return p


def prepare_params(raw):
    """Hoist all weight-side work (BN fold, HWIO->(K,N) reshape, bf16 cast,
    (2,N) scale/shift packing, deconv sub-pixel split+flip) out of forward."""
    prep = {}
    for name in list(_CONV_LAYERS) + ["up_dim"]:
        prep[name] = _prep_conv(raw[name])
    for name in _DECONV_LAYERS:
        prep[name] = _prep_deconv(raw[name])
    for name in _ASA_LAYERS:
        prep[name] = raw[name]
    return prep


# ----------------------------------------------------------------------------
# Full forward pass (mirrors Siamese_rgb.forward).
# ----------------------------------------------------------------------------
def siamese_rgb_forward(prep, pan_nchw, ms_nchw):
    pan = jnp.transpose(pan_nchw, (0, 2, 3, 1)).astype(jnp.bfloat16)  # NCHW->NHWC
    ms = jnp.transpose(ms_nchw, (0, 2, 3, 1)).astype(jnp.bfloat16)
    p = prep

    e1 = conv_block(pan, p["SL_1"], 4, 2, 1)
    e1 = asa_attention(e1, p["ASA1"])
    e2 = conv_block(e1, p["SL_2"], 4, 2, 1)
    e3 = conv_block(e2, p["SL_3"], 4, 2, 1)
    e3 = asa_attention(e3, p["ASA2"])
    e4 = conv_block(e3, p["SL_4"], 4, 2, 1)
    e5 = conv_block(e4, p["SL_5"], 4, 2, 1)

    e1_1 = deconv_block(ms, p["SR_1"])
    e1_1 = asa_attention(e1_1, p["ASA3"])
    e2_1 = conv_block(e1_1, p["SR_2"], 4, 2, 1)
    e3_1 = conv_block(e2_1, p["SR_3"], 4, 2, 1)
    e3_1 = asa_attention(e3_1, p["ASA4"])
    e4_1 = conv_block(e3_1, p["SR_4"], 4, 2, 1)
    e5_1 = conv_block(e4_1, p["SR_5"], 4, 2, 1)

    c1 = jnp.concatenate([e1, e1_1], axis=-1)
    c2 = jnp.concatenate([e2, e2_1], axis=-1)
    c3 = jnp.concatenate([e3, e3_1], axis=-1)
    c4 = jnp.concatenate([e4, e4_1], axis=-1)
    c5 = jnp.concatenate([e5, e5_1], axis=-1)

    d1 = deconv_block(c5, p["cat1"])
    d1 = jnp.concatenate([d1, c4], axis=-1)
    d1 = asa_attention(d1, p["ASA5"])
    d2 = deconv_block(d1, p["cat2"])
    d2 = jnp.concatenate([d2, c3], axis=-1)
    d3 = deconv_block(d2, p["cat3"])
    d3 = jnp.concatenate([d3, c2], axis=-1)
    d3 = asa_attention(d3, p["ASA6"])
    d4 = deconv_block(d3, p["cat4"])
    d4 = jnp.concatenate([d4, c1], axis=-1)

    up_ms = upsample_bilinear_x2(e1_1)                               # f32
    up_dim = conv_block(pan, p["up_dim"], 1, 1, 0).astype(jnp.float32)
    d5 = jnp.concatenate([up_dim, up_ms], axis=-1)

    to_nchw = lambda t: jnp.transpose(t.astype(jnp.float32), (0, 3, 1, 2))
    return tuple(to_nchw(t) for t in (d1, d2, d3, d4, d5))


# ----------------------------------------------------------------------------
# Pure-XLA references (same bf16 operands, f32 accumulation) for verification.
# ----------------------------------------------------------------------------
def _conv_reference(x, praw, k, stride, pad):
    sc, sh = _bn_fold(praw)
    y = jax.lax.conv_general_dilated(
        x.astype(jnp.bfloat16), praw["w"].astype(jnp.bfloat16),
        (stride, stride), [(pad, pad), (pad, pad)],
        dimension_numbers=("NHWC", "HWIO", "NHWC"),
        preferred_element_type=jnp.float32)
    return jnp.maximum(y * sc + sh, 0.0)


def _deconv_reference(x, praw):
    sc, sh = _bn_fold(praw)
    w_flip = praw["w"][::-1, ::-1, :, :].astype(jnp.bfloat16)
    y = jax.lax.conv_general_dilated(
        x.astype(jnp.bfloat16), w_flip, (1, 1), [(2, 2), (2, 2)],
        lhs_dilation=(2, 2),
        dimension_numbers=("NHWC", "HWIO", "NHWC"),
        preferred_element_type=jnp.float32)
    return jnp.maximum(y * sc + sh, 0.0)


if __name__ == "__main__":
    raw = build_params(seed=0)
    prep = prepare_params(raw)

    key = jax.random.PRNGKey(0)
    k_pan, k_ms = jax.random.split(key)
    # Pan is 4x the spatial resolution of Ms (so the two siamese branches match).
    pan = jax.random.normal(k_pan, (2, 3, 64, 64), jnp.float32)
    ms = jax.random.normal(k_ms, (2, 3, 16, 16), jnp.float32)

    # --- numerical reference checks (conv + transposed conv) --------------
    pan_nhwc = jnp.transpose(pan, (0, 2, 3, 1)).astype(jnp.bfloat16)
    ms_nhwc = jnp.transpose(ms, (0, 2, 3, 1)).astype(jnp.bfloat16)

    y_conv = jax.jit(lambda x, pp: conv_block(x, pp, 4, 2, 1))(
        pan_nhwc, prep["SL_1"]).astype(jnp.float32)
    r_conv = _conv_reference(pan_nhwc, raw["SL_1"], 4, 2, 1)
    err_conv = float(jnp.max(jnp.abs(y_conv - r_conv)))
    assert err_conv < 5e-2, f"conv_block mismatch vs lax reference: {err_conv}"

    y_dec = jax.jit(deconv_block)(ms_nhwc, prep["SR_1"]).astype(jnp.float32)
    r_dec = _deconv_reference(ms_nhwc, raw["SR_1"])
    err_dec = float(jnp.max(jnp.abs(y_dec - r_dec)))
    assert err_dec < 5e-2, f"deconv_block mismatch vs lax reference: {err_dec}"

    # --- full forward -------------------------------------------------------
    fwd = jax.jit(siamese_rgb_forward)
    outs = jax.block_until_ready(fwd(prep, pan, ms))

    expected = [(2, 1024, 4, 4), (2, 512, 8, 8), (2, 256, 16, 16),
                (2, 128, 32, 32), (2, 64, 64, 64)]
    for o, shp in zip(outs, expected):
        assert o.shape == shp, (o.shape, shp)
        assert bool(jnp.all(jnp.isfinite(o)))
    print("KERNEL_OK")
</pallas_src>

<mosaic_0001>
module attributes {stable_mosaic.version = 11 : i64} {
  func.func @_mm_affine_kernel(%arg0: i32, %arg1: i32, %arg2: i32, %arg3: i32, %arg4: memref<1x1024x128xbf16, #tpu.memory_space<vmem>>, %arg5: memref<1x128x128xbf16, #tpu.memory_space<vmem>>, %arg6: memref<2x128xf32, #tpu.memory_space<vmem>>, %arg7: memref<1x1024x128xbf16, #tpu.memory_space<vmem>>, %arg8: memref<1024x128xf32, #tpu.memory_space<vmem>>) attributes {dimension_semantics = [#tpu.dimension_semantics<parallel>, #tpu.dimension_semantics<parallel>, #tpu.dimension_semantics<parallel>, #tpu.dimension_semantics<arbitrary>], iteration_bounds = array<i64: 2, 1, 1, 1>, scalar_prefetch = 0 : i64, scratch_operands = 1 : i64, tpu.core_type = #tpu.core_type<tc>, window_params = [{transform_indices = @transform_0, window_bounds = array<i64: 1, 1024, 128>}, {transform_indices = @transform_1, window_bounds = array<i64: 1, 128, 128>}, {transform_indices = @transform_2, window_bounds = array<i64: 2, 128>}, {transform_indices = @transform_3, window_bounds = array<i64: 1, 1024, 128>}]} {
    %c0_i32 = arith.constant 0 : i32
    %0 = arith.cmpi eq, %arg3, %c0_i32 : i32
    %1 = arith.extui %0 : i1 to i32
    %c0_i32_0 = arith.constant 0 : i32
    %2 = arith.cmpi ne, %1, %c0_i32_0 : i32
    scf.if %2 {
      %cst_12 = arith.constant 0.000000e+00 : f32
      %14 = vector.broadcast %cst_12 : f32 to vector<1024x128xf32>
      %c0_13 = arith.constant 0 : index
      %c0_14 = arith.constant 0 : index
      %15 = vector.load %arg8[%c0_13, %c0_14] : memref<1024x128xf32, #tpu.memory_space<vmem>>, vector<1024x128xf32>
      tpu.vector_store %arg8[%c0_13, %c0_14], %14 {strides = array<i32>} : memref<1024x128xf32, #tpu.memory_space<vmem>>, vector<1024x128xf32>,
    } else {
    }
    %c0 = arith.constant 0 : index
    %c0_1 = arith.constant 0 : index
    %3 = vector.load %arg8[%c0, %c0_1] : memref<1024x128xf32, #tpu.memory_space<vmem>>, vector<1024x128xf32>
    %c0_2 = arith.constant 0 : index
    %c0_3 = arith.constant 0 : index
    %c0_4 = arith.constant 0 : index
    %4 = vector.load %arg4[%c0_2, %c0_3, %c0_4] : memref<1x1024x128xbf16, #tpu.memory_space<vmem>>, vector<1x1024x128xbf16>
    %5 = vector.shape_cast %4 : vector<1x1024x128xbf16> to vector<1024x128xbf16>
    %c0_5 = arith.constant 0 : index
    %c0_6 = arith.constant 0 : index
    %c0_7 = arith.constant 0 : index
    %6 = vector.load %arg5[%c0_5, %c0_6, %c0_7] : memref<1x128x128xbf16, #tpu.memory_space<vmem>>, vector<1x128x128xbf16>
    %7 = vector.shape_cast %6 : vector<1x128x128xbf16> to vector<128x128xbf16>
    %cst = arith.constant dense<0.000000e+00> : vector<1024x128xf32>
    %8 = tpu.matmul %5, %7, %cst {dimension_numbers = #tpu.dot_dimension_numbers<[1], [0], [0], [1], [0, 0, 1, 1], [], []>} : vector<1024x128xbf16>, vector<128x128xbf16>, vector<1024x128xf32> -> vector<1024x128xf32>
    %9 = arith.addf %3, %8 : vector<1024x128xf32>
    %c0_8 = arith.constant 0 : index
    %c0_9 = arith.constant 0 : index
    %10 = vector.load %arg8[%c0_8, %c0_9] : memref<1024x128xf32, #tpu.memory_space<vmem>>, vector<1024x128xf32>
    tpu.vector_store %arg8[%c0_8, %c0_9], %9 {strides = array<i32>} : memref<1024x128xf32, #tpu.memory_space<vmem>>, vector<1024x128xf32>,
    %c0_i32_10 = arith.constant 0 : i32
    %11 = arith.cmpi eq, %arg3, %c0_i32_10 : i32
    %12 = arith.extui %11 : i1 to i32
    %c0_i32_11 = arith.constant 0 : i32
    %13 = arith.cmpi ne, %12, %c0_i32_11 : i32
    scf.if %13 {
      %c0_12 = arith.constant 0 : index
      %c0_13 = arith.constant 0 : index
      %14 = vector.load %arg8[%c0_12, %c0_13] : memref<1024x128xf32, #tpu.memory_space<vmem>>, vector<1024x128xf32>
      %c0_14 = arith.constant 0 : index
      %c0_15 = arith.constant 0 : index
      %15 = vector.load %arg6[%c0_14, %c0_15] : memref<2x128xf32, #tpu.memory_space<vmem>>, vector<1x128xf32>
      %16 = vector.broadcast %15 : vector<1x128xf32> to vector<1024x128xf32>
      %17 = arith.mulf %14, %16 : vector<1024x128xf32>
      %c1 = arith.constant 1 : index
      %c0_16 = arith.constant 0 : index
      %18 = vector.load %arg6[%c1, %c0_16] : memref<2x128xf32, #tpu.memory_space<vmem>>, vector<1x128xf32>
      %19 = vector.broadcast %18 : vector<1x128xf32> to vector<1024x128xf32>
      %20 = arith.addf %17, %19 : vector<1024x128xf32>
      %cst_17 = arith.constant 0.000000e+00 : f32
      %21 = vector.broadcast %cst_17 : f32 to vector<1024x128xf32>
      %22 = arith.maximumf %20, %21 : vector<1024x128xf32>
      %23 = arith.truncf %22 : vector<1024x128xf32> to vector<1024x128xbf16>
      %c0_18 = arith.constant 0 : index
      %c0_19 = arith.constant 0 : index
      %c0_20 = arith.constant 0 : index
      %24 = vector.load %arg7[%c0_18, %c0_19, %c0_20] : memref<1x1024x128xbf16, #tpu.memory_space<vmem>>, vector<1x1024x128xbf16>
      %25 = vector.shape_cast %24 : vector<1x1024x128xbf16> to vector<1024x128xbf16>
      %26 = vector.shape_cast %23 : vector<1024x128xbf16> to vector<1x1024x128xbf16>
      tpu.vector_store %arg7[%c0_18, %c0_19, %c0_20], %26 {strides = array<i32>} : memref<1x1024x128xbf16, #tpu.memory_space<vmem>>, vector<1x1024x128xbf16>,
    } else {
    }
    return
  }
  func.func @transform_0(%arg0: i32, %arg1: i32, %arg2: i32, %arg3: i32) -> (i32, i32, i32) {
    %c0_i32 = arith.constant 0 : i32
    return %arg1, %arg0, %arg3 : i32, i32, i32
  }
  func.func @transform_1(%arg0: i32, %arg1: i32, %arg2: i32, %arg3: i32) -> (i32, i32, i32) {
    %c0_i32 = arith.constant 0 : i32
    return %arg1, %arg3, %arg2 : i32, i32, i32
  }
  func.func @transform_2(%arg0: i32, %arg1: i32, %arg2: i32, %arg3: i32) -> (i32, i32) {
    %c0_i32 = arith.constant 0 : i32
    %c0_i32_0 = arith.constant 0 : i32
    return %c0_i32, %arg2 : i32, i32
  }
  func.func @transform_3(%arg0: i32, %arg1: i32, %arg2: i32, %arg3: i32) -> (i32, i32, i32) {
    %c0_i32 = arith.constant 0 : i32
    return %arg1, %arg0, %arg2 : i32, i32, i32
  }
}

</mosaic_0001>

<bundles_post_ra>
// kernel: _lambda_.1
= control target key start
LH: loop header
LB: loop body
LE: loop exit
PB: predicated region body
PF: predicated region fallthrough
CT: control target
= control target key end

     0   :  { %8 = vsyncpa [#allocation4], 0  ;;  %s4985_s0 = inlined_call_operand.vmem [shape: bf16[1,2048,128], index: 0, kind: input, shape index: {}]   ;;  %s4986_s1 = inlined_call_operand.vmem [shape: bf16[1,128,128], index: 1, kind: input, shape index: {}]   ;;  %s4987_s2 = inlined_call_operand.vmem [shape: f32[2,128], index: 2, kind: input, shape index: {}]   ;;  %s4988_s3 = inlined_call_operand.hbm [shape: bf16[1,2048,128], index: 3, kind: output, shape index: {}]  }
   0x1   :  { %10 = vsyncpa [#allocation4 + $0x1], 0  ;;  %s4434_s12 = smov 0   ;;  %s4436_s13 = smov 0  }
   0x2   :  { %s4438_s14 = smov 0   ;;  %s4440_s15 = smov 0  }
   0x3   :  { %s4442_s16 = smov 0   ;;  %s4444_s17 = smov 0  }
   0x4 LB: > { %s3239_s18 = sadd.s32 4294967295, %s4409_s17   ;;  %s3240_s19 = sadd.s32 4294967294, %s4409_s17   ;;  %s4409_s17 = sphi %s4444_s17, %s16_s17   ;;  %s4405_s16 = sphi %s4442_s16, %s4995_s16   ;;  %s4401_s15 = sphi %s4440_s15, %s4994_s15   ;;  %s4397_s14 = sphi %s4438_s14, %s4993_s14   ;;  %s4393_s13 = sphi %s4436_s13, %s4992_s13   ;;  %s4389_s12 = sphi %s4434_s12, %s4991_s12  }
   0x5   : > { %s42_s20 = sadd.s32 1, %s4405_s16  ;;  %s139_s21 = sadd.s32 1, %s4397_s14 }
   0x6   : > { %p44_p0 = scmp.ge.s32.totalorder %s42_s20, 2  ;;  %p149_p1 = scmp.ne.s32.totalorder %s4397_s14, %s4393_s13 }
   0x7   : > { %p150_p2 = scmp.eq.s32.totalorder %s3239_s18, 1  ;;  %p155_p3 = scmp.ne.s32.totalorder %s4393_s13, %s4389_s12 }
   0x8   : > { %s4997_s20 = smov (%p44_p0, %s42_s20), 0  ;;  %p156_p5 = scmp.eq.s32.totalorder %s3240_s19, 1 }
   0x9   : > { %p4474_p4 = por %p150_p2, %p149_p1  ;;  %s133_s23 = ssub.s32 %s4405_s16, %s4997_s20 }
   0xa   : > { %p3245_p6 = scmp.ge.s32.totalorder %s4409_s17, 1  ;;  %p137_p7 = scmp.eq.s32.totalorder %s133_s23, 0 }
   0xb   : > { %p4481_p8 = por %p156_p5, %p155_p3  ;;  %p213_p9 = scmp.lt.s32.totalorder %s4409_s17, 3 }
   0xc   : > { %s4487_s25 = scalar_select %p137_p7, %s4397_s14, %s139_s21  }
   0xd   : > { %p214_p10 = pnand %p3245_p6, %p213_p9 }
   0xe   : > { %v4257_v0 = vld [vmem:[%s4986_s1] sm:$0xff] (!%p214_p10)   ;;  %s3247_s28 = sshll.u32 (!%p214_p10), %s4401_s15, 7  ;;  %v4258_v1 = vld [vmem:[%s4986_s1 + $0x8] sm:$0xff] (!%p214_p10)   ;;  %v4259_v2 = vld [vmem:[%s4986_s1 + $0x10] sm:$0xff] (!%p214_p10)   ;;  %s257_s7 = sand.u32 (!%p214_p10), 1, %s4393_s13  }
   0xf   : > { %217 = sbr.rel (%p214_p10) target bundleno = 406 (0x196), region = 32  ;;  %p263_p11 = scmp.lt.s32.totalorder (!%p214_p10), %s3247_s28, 255  ;;  %4040 = vmatprep.subr.bf16.mxu0 (!%p214_p10), %v4257_v0  ;;  %4184 = vmatprep.subr.bf16.mxu1 (!%p214_p10), %v4257_v0  ;;  %v4260_v3 = vld [vmem:[%s4986_s1 + $0x18] sm:$0xff] (!%p214_p10)   ;;  %v4261_v6 = vld [vmem:[%s4986_s1 + $0x20] sm:$0xff] (!%p214_p10)   ;;  %v4262_v7 = vld [vmem:[%s4986_s1 + $0x28] sm:$0xff] (!%p214_p10)  }
  0x10   : > { %4041 = vmatpush3.bf16.msra.mxu0 (!%p214_p10), %v4257_v0  ;;  %4192 = vmatpush3.bf16.msra.mxu1 (!%p214_p10), %v4257_v0  ;;  %v4263_v8 = vld [vmem:[%s4986_s1 + $0x30] sm:$0xff] (!%p214_p10)   ;;  %v4264_v9 = vld [vmem:[%s4986_s1 + $0x38] sm:$0xff] (!%p214_p10)   ;;  %s3246_s8 = sshll.u32 (!%p214_p10), %s257_s7, 9  ;;  %s3584_s21 = sshll.u32 (!%p214_p10), %s4401_s15, 13 }
  0x11   : > { %4042 = vmatprep.subr.bf16.mxu0 (!%p214_p10), %v4258_v1  ;;  %4185 = vmatprep.subr.bf16.mxu1 (!%p214_p10), %v4258_v1  ;;  %s4929_s15 = scalar_lea.hbm (!%p214_p10), %s4988_s3, %s3584_s21  ;;  %s4411_s30 = smov (!%p214_p10), [#allocation3]  }
  0x12   : > { %s4335_s4 = sshll.u32 (!%p214_p10), %s4411_s30, 4  ;;  %s4336_s4 = int_to_ptr.vmem [resolvable:$false] %s4335_s4 }
  0x13   : > { %s4337_s5 = scalar_lea.vmem (!%p214_p10), %s4336_s4, 16384 }
  0x14   : > { %4043 = vmatpush3.bf16.msra.mxu0 (!%p214_p10), %v4258_v1  ;;  %4193 = vmatpush3.bf16.msra.mxu1 (!%p214_p10), %v4258_v1 }
  0x15   : > { %4044 = vmatprep.subr.bf16.mxu0 (!%p214_p10), %v4259_v2  ;;  %4186 = vmatprep.subr.bf16.mxu1 (!%p214_p10), %v4259_v2 }
  0x16   : > { %s4999_s28 = smov (!%p263_p11, %s3247_s28), 255 }
  0x17   : > { %s3248_s6 = sshll.u32 %s4999_s28, 2  ;;  %s4939_s28 = scalar_lea.sflag [#allocation4], %s257_s7 }
  0x18   : > { %s4502_s9 = scalar_lea.vmem %s4985_s0, %s3248_s6  ;;  %4045 = vmatpush3.bf16.msra.mxu0 %v4259_v2  ;;  %4194 = vmatpush3.bf16.msra.mxu1 %v4259_v2 }
  0x19   : > { %v4265_v4 = vld [vmem:[%s4502_s9] sm:$0xff]   ;;  %4046 = vmatprep.subr.bf16.mxu0 %v4260_v3  ;;  %4187 = vmatprep.subr.bf16.mxu1 %v4260_v3  ;;  %v4267_v10 = vld [vmem:[%s4502_s9 + $0x8] sm:$0xff]   ;;  %v4269_v12 = vld [vmem:[%s4502_s9 + $0x10] sm:$0xff]  }
  0x1a   : > { %v4266_v5 = vld [vmem:[%s4502_s9 + $0x100] sm:$0xff]   ;;  %4056 = vmatprep.mubr.bf16.mxu0 %v4265_v4  ;;  %v4268_v11 = vld [vmem:[%s4502_s9 + $0x108] sm:$0xff]   ;;  %v4270_v13 = vld [vmem:[%s4502_s9 + $0x110] sm:$0xff]  }
  0x1b   : > { %4120 = vmatprep.mubr.bf16.mxu1 %v4266_v5  ;;  %v4271_v14 = vld [vmem:[%s4502_s9 + $0x18] sm:$0xff]   ;;  %v4273_v16 = vld [vmem:[%s4502_s9 + $0x20] sm:$0xff]   ;;  %v4275_v18 = vld [vmem:[%s4502_s9 + $0x28] sm:$0xff]  }
  0x1c   : > { %4047 = vmatpush3.bf16.msra.mxu0 %v4260_v3  ;;  %4195 = vmatpush3.bf16.msra.mxu1 %v4260_v3  ;;  %v4272_v15 = vld [vmem:[%s4502_s9 + $0x118] sm:$0xff]   ;;  %v4274_v17 = vld [vmem:[%s4502_s9 + $0x120] sm:$0xff]   ;;  %v4276_v19 = vld [vmem:[%s4502_s9 + $0x128] sm:$0xff]  }
  0x1d   : > { %4048 = vmatprep.subr.bf16.mxu0 %v4261_v6  ;;  %4188 = vmatprep.subr.bf16.mxu1 %v4261_v6  ;;  %v4277_v20 = vld [vmem:[%s4502_s9 + $0x30] sm:$0xff]   ;;  %v4279_v22 = vld [vmem:[%s4502_s9 + $0x38] sm:$0xff]   ;;  %v4281_v24 = vld [vmem:[%s4502_s9 + $0x40] sm:$0xff]  }
  0x1e   : > { %v4278_v21 = vld [vmem:[%s4502_s9 + $0x130] sm:$0xff]   ;;  %v4280_v23 = vld [vmem:[%s4502_s9 + $0x138] sm:$0xff]   ;;  %v4282_v25 = vld [vmem:[%s4502_s9 + $0x140] sm:$0xff]  }
  0x1f   : > { %v4283_v26 = vld [vmem:[%s4502_s9 + $0x48] sm:$0xff]   ;;  %v4285_v28 = vld [vmem:[%s4502_s9 + $0x50] sm:$0xff]   ;;  %v4287_v30 = vld [vmem:[%s4502_s9 + $0x58] sm:$0xff]  }
  0x20   : > { %4049 = vmatpush3.bf16.msra.mxu0 %v4261_v6  ;;  %4196 = vmatpush3.bf16.msra.mxu1 %v4261_v6  ;;  %v4284_v27 = vld [vmem:[%s4502_s9 + $0x148] sm:$0xff]   ;;  %v4286_v29 = vld [vmem:[%s4502_s9 + $0x150] sm:$0xff]   ;;  %v4288_v31 = vld [vmem:[%s4502_s9 + $0x158] sm:$0xff]  }
  0x21   : > { %4050 = vmatprep.subr.bf16.mxu0 %v4262_v7  ;;  %4189 = vmatprep.subr.bf16.mxu1 %v4262_v7  ;;  %v4289_v32 = vld [vmem:[%s4502_s9 + $0x60] sm:$0xff]   ;;  %v4291_v34 = vld [vmem:[%s4502_s9 + $0x68] sm:$0xff]   ;;  %v4293_v36 = vld [vmem:[%s4502_s9 + $0x70] sm:$0xff]  }
  0x22   : > { %v4290_v33 = vld [vmem:[%s4502_s9 + $0x160] sm:$0xff]   ;;  %v4292_v35 = vld [vmem:[%s4502_s9 + $0x168] sm:$0xff]   ;;  %v4294_v37 = vld [vmem:[%s4502_s9 + $0x170] sm:$0xff]  }
  0x23   : > { %v4295_v38 = vld [vmem:[%s4502_s9 + $0x78] sm:$0xff]   ;;  %v4297_v40 = vld [vmem:[%s4502_s9 + $0x80] sm:$0xff]   ;;  %v4299_v42 = vld [vmem:[%s4502_s9 + $0x88] sm:$0xff]  }
  0x24   : > { %4051 = vmatpush3.bf16.msra.mxu0 %v4262_v7  ;;  %4197 = vmatpush3.bf16.msra.mxu1 %v4262_v7  ;;  %v4296_v39 = vld [vmem:[%s4502_s9 + $0x178] sm:$0xff]   ;;  %v4298_v41 = vld [vmem:[%s4502_s9 + $0x180] sm:$0xff]   ;;  %v4300_v43 = vld [vmem:[%s4502_s9 + $0x188] sm:$0xff]  }
  0x25   : > { %4052 = vmatprep.subr.bf16.mxu0 %v4263_v8  ;;  %4190 = vmatprep.subr.bf16.mxu1 %v4263_v8  ;;  %v4301_v44 = vld [vmem:[%s4502_s9 + $0x90] sm:$0xff]   ;;  %v4303_v46 = vld [vmem:[%s4502_s9 + $0x98] sm:$0xff]   ;;  %v4305_v48 = vld [vmem:[%s4502_s9 + $0xa0] sm:$0xff]  }
  0x26   : > { %v4302_v45 = vld [vmem:[%s4502_s9 + $0x190] sm:$0xff]   ;;  %v4304_v47 = vld [vmem:[%s4502_s9 + $0x198] sm:$0xff]   ;;  %v4306_v49 = vld [vmem:[%s4502_s9 + $0x1a0] sm:$0xff]  }
  0x27   : > { %v4307_v50 = vld [vmem:[%s4502_s9 + $0xa8] sm:$0xff]   ;;  %v4309_v52 = vld [vmem:[%s4502_s9 + $0xb0] sm:$0xff]   ;;  %v4311_v54 = vld [vmem:[%s4502_s9 + $0xb8] sm:$0xff]  }
  0x28   : > { %4053 = vmatpush3.bf16.msra.mxu0 %v4263_v8  ;;  %4198 = vmatpush3.bf16.msra.mxu1 %v4263_v8  ;;  %v4308_v51 = vld [vmem:[%s4502_s9 + $0x1a8] sm:$0xff]   ;;  %v4310_v53 = vld [vmem:[%s4502_s9 + $0x1b0] sm:$0xff]   ;;  %v4312_v55 = vld [vmem:[%s4502_s9 + $0x1b8] sm:$0xff]  }
  0x29   : > { %4054 = vmatprep.subr.bf16.mxu0 %v4264_v9  ;;  %4191 = vmatprep.subr.bf16.mxu1 %v4264_v9  ;;  %v4313_v56 = vld [vmem:[%s4502_s9 + $0xc0] sm:$0xff]   ;;  %v4315_v58 = vld [vmem:[%s4502_s9 + $0xc8] sm:$0xff]   ;;  %v4317_v60 = vld [vmem:[%s4502_s9 + $0xd0] sm:$0xff]  }
  0x2a   : > { %v4314_v57 = vld [vmem:[%s4502_s9 + $0x1c0] sm:$0xff]   ;;  %v4316_v59 = vld [vmem:[%s4502_s9 + $0x1c8] sm:$0xff]   ;;  %v4318_v61 = vld [vmem:[%s4502_s9 + $0x1d0] sm:$0xff]  }
  0x2b   : > { %v4319_v62 = vld [vmem:[%s4502_s9 + $0xd8] sm:$0xff]   ;;  %v4321_v0 = vld [vmem:[%s4502_s9 + $0xe0] sm:$0xff]   ;;  %v4323_v2 = vld [vmem:[%s4502_s9 + $0xe8] sm:$0xff]  }
  0x2c   : > { %4055 = vmatpush3.bf16.msra.mxu0 %v4264_v9  ;;  %4199 = vmatpush3.bf16.msra.mxu1 %v4264_v9  ;;  %v4320_v63 = vld [vmem:[%s4502_s9 + $0x1d8] sm:$0xff]   ;;  %v4322_v1 = vld [vmem:[%s4502_s9 + $0x1e0] sm:$0xff]   ;;  %v4324_v3 = vld [vmem:[%s4502_s9 + $0x1e8] sm:$0xff]  }
  0x2d   : > { %v4325_v4 = vld [vmem:[%s4502_s9 + $0xf0] sm:$0xff]   ;;  %v4327_v6 = vld [vmem:[%s4502_s9 + $0xf8] sm:$0xff]   ;;  %v4586_v8 = vld [vmem:[%s4987_s2] ss:$0 sm:$0xff] }
  0x2e   : > { %v4326_v5 = vld [vmem:[%s4502_s9 + $0x1f0] sm:$0xff]   ;;  %v4328_v7 = vld [vmem:[%s4502_s9 + $0x1f8] sm:$0xff]   ;;  %s4616_s9 = scalar_lea.vmem [#allocation3], %s3246_s8 }
  0x2f   : > { %4057 = vmatmul.mubr.bf16.vlgmr.msra.gmra.mrb[0].mxu0 %v4267_v10  ;;  %4121 = vmatmul.mubr.bf16.vlgmr.msra.gmra.mrb[0].mxu1 %v4268_v11  ;;  %v4591_v10 = vld [vmem:[%s4987_s2 + $0x1] ss:$0 sm:$0xff]  ;;  %s3111_s23 = sshll.u32 %s4616_s9, 4  ;;  %s4931_s23 = int_to_ptr.vmem [resolvable:$true] %s3111_s23 }
  0x30   : > { %4060 = vmatprep.mubr.bf16.mxu0 %v4269_v12  ;;  %4124 = vmatprep.mubr.bf16.mxu1 %v4270_v13  ;;  %s4331_s29 = scalar_lea.vmem %s4931_s23, 8192  ;;  %p4338_p1 = scmp.lt.s32.totalorder %s4931_s23, %s4336_s4 }
  0x31   : > { %p4332_p12 = scmp.ne.s32.totalorder %s4931_s23, %s4331_s29  ;;  %p4339_p2 = scmp.lt.s32.totalorder %s4337_s5, %s4331_s29 }
  0x33   : > { %p4333_p13 = pnand %p4332_p12, %p4474_p4  ;;  %p4340_p3 = por %p4339_p2, %p4338_p1 }
  0x35   : > { %p4334_p0 = pneg %p4333_p13 }
  0x37   : > { %4061 = vmatmul.mubr.bf16.gmra.mrb[4].mxu0 %v4271_v14  ;;  %4125 = vmatmul.mubr.bf16.gmra.mrb[4].mxu1 %v4272_v15  ;;  %p4341_p5 = pnand %p4340_p3, %p4334_p0 }
  0x38   : > { %4064 = vmatprep.mubr.bf16.mxu0 %v4273_v16  ;;  %4128 = vmatprep.mubr.bf16.mxu1 %v4274_v17 }
  0x3f   : > { %4065 = vmatmul.mubr.bf16.gmra.mrb[8].mxu0 %v4275_v18  ;;  %4129 = vmatmul.mubr.bf16.gmra.mrb[8].mxu1 %v4276_v19 }
  0x40   : > { %4068 = vmatprep.mubr.bf16.mxu0 %v4277_v20  ;;  %4132 = vmatprep.mubr.bf16.mxu1 %v4278_v21 }
  0x47   : > { %4069 = vmatmul.mubr.bf16.gmra.mrb[12].mxu0 %v4279_v22  ;;  %4133 = vmatmul.mubr.bf16.gmra.mrb[12].mxu1 %v4280_v23 }
  0x48   : > { %4072 = vmatprep.mubr.bf16.mxu0 %v4281_v24  ;;  %4136 = vmatprep.mubr.bf16.mxu1 %v4282_v25 }
  0x4f   : > { %4073 = vmatmul.mubr.bf16.gmra.mrb[16].mxu0 %v4283_v26  ;;  %4137 = vmatmul.mubr.bf16.gmra.mrb[16].mxu1 %v4284_v27 }
  0x50   : > { %4076 = vmatprep.mubr.bf16.mxu0 %v4285_v28  ;;  %4140 = vmatprep.mubr.bf16.mxu1 %v4286_v29 }
  0x57   : > { %4077 = vmatmul.mubr.bf16.gmra.mrb[20].mxu0 %v4287_v30  ;;  %4141 = vmatmul.mubr.bf16.gmra.mrb[20].mxu1 %v4288_v31 }
  0x58   : > { %4080 = vmatprep.mubr.bf16.mxu0 %v4289_v32  ;;  %4144 = vmatprep.mubr.bf16.mxu1 %v4290_v33 }
  0x5f   : > { %4081 = vmatmul.mubr.bf16.gmra.mrb[24].mxu0 %v4291_v34  ;;  %4145 = vmatmul.mubr.bf16.gmra.mrb[24].mxu1 %v4292_v35 }
  0x60   : > { %4084 = vmatprep.mubr.bf16.mxu0 %v4293_v36  ;;  %4148 = vmatprep.mubr.bf16.mxu1 %v4294_v37 }
  0x67   : > { %4085 = vmatmul.mubr.bf16.gmra.mrb[28].mxu0 %v4295_v38  ;;  %4149 = vmatmul.mubr.bf16.gmra.mrb[28].mxu1 %v4296_v39 }
  0x68   : > { %4088 = vmatprep.mubr.bf16.mxu0 %v4297_v40  ;;  %4152 = vmatprep.mubr.bf16.mxu1 %v4298_v41 }
  0x6f   : > { %4089 = vmatmul.mubr.bf16.gmra.mrb[32].mxu0 %v4299_v42  ;;  %4153 = vmatmul.mubr.bf16.gmra.mrb[32].mxu1 %v4300_v43 }
  0x70   : > { %4092 = vmatprep.mubr.bf16.mxu0 %v4301_v44  ;;  %4156 = vmatprep.mubr.bf16.mxu1 %v4302_v45 }
  0x77   : > { %4093 = vmatmul.mubr.bf16.gmra.mrb[36].mxu0 %v4303_v46  ;;  %4157 = vmatmul.mubr.bf16.gmra.mrb[36].mxu1 %v4304_v47 }
  0x78   : > { %4096 = vmatprep.mubr.bf16.mxu0 %v4305_v48  ;;  %4160 = vmatprep.mubr.bf16.mxu1 %v4306_v49 }
  0x7f   : > { %4097 = vmatmul.mubr.bf16.gmra.mrb[40].mxu0 %v4307_v50  ;;  %4161 = vmatmul.mubr.bf16.gmra.mrb[40].mxu1 %v4308_v51 }
  0x80   : > { %4100 = vmatprep.mubr.bf16.mxu0 %v4309_v52  ;;  %4164 = vmatprep.mubr.bf16.mxu1 %v4310_v53 }
  0x87   : > { %4101 = vmatmul.mubr.bf16.gmra.mrb[44].mxu0 %v4311_v54  ;;  %4165 = vmatmul.mubr.bf16.gmra.mrb[44].mxu1 %v4312_v55 }
  0x88   : > { %4104 = vmatprep.mubr.bf16.mxu0 %v4313_v56  ;;  %4168 = vmatprep.mubr.bf16.mxu1 %v4314_v57 }
  0x8f   : > { %4105 = vmatmul.mubr.bf16.gmra.mrb[48].mxu0 %v4315_v58  ;;  %4169 = vmatmul.mubr.bf16.gmra.mrb[48].mxu1 %v4316_v59 }
  0x90   : > { %4108 = vmatprep.mubr.bf16.mxu0 %v4317_v60  ;;  %4172 = vmatprep.mubr.bf16.mxu1 %v4318_v61 }
  0x97   : > { %4109 = vmatmul.mubr.bf16.gmra.mrb[52].mxu0 %v4319_v62  ;;  %4173 = vmatmul.mubr.bf16.gmra.mrb[52].mxu1 %v4320_v63 }
  0x98   : > { %4112 = vmatprep.mubr.bf16.mxu0 %v4321_v0  ;;  %4176 = vmatprep.mubr.bf16.mxu1 %v4322_v1 }
  0x9f   : > { %4113 = vmatmul.mubr.bf16.gmra.mrb[56].mxu0 %v4323_v2  ;;  %4177 = vmatmul.mubr.bf16.gmra.mrb[56].mxu1 %v4324_v3 }
  0xa0   : > { %4116 = vmatprep.mubr.bf16.mxu0 %v4325_v4  ;;  %4180 = vmatprep.mubr.bf16.mxu1 %v4326_v5 }
  0xa7   : > { %4117 = vmatmul.mubr.bf16.gmra.mrb[60].mxu0 %v4327_v6  ;;  %4181 = vmatmul.mubr.bf16.gmra.mrb[60].mxu1 %v4328_v7 }
 0x102   : > { %v4058_v9 = vpop.f32.mrb[0].mxu0  ;;  %v4122_v11 = vpop.f32.mrb[0].mxu1 }
 0x103   : > { %v2067_v12 = vmul.f32 %v4058_v9, %v4586_v8  ;;  %v2131_v13 = vmul.f32 %v4122_v11, %v4586_v8  ;;  %v1162_v14 = vpop.f32.mrb[1].mxu0  ;;  %v1418_v15 = vpop.f32.mrb[1].mxu1 }
 0x104   : > { %v2065_v16 = vmul.f32 %v4586_v8, %v1162_v14  ;;  %v2129_v17 = vmul.f32 %v4586_v8, %v1418_v15  ;;  %v4059_v18 = vpop.f32.mrb[2].mxu0  ;;  %v4123_v19 = vpop.f32.mrb[2].mxu1 }
 0x105   : > { %v2200_v20 = vadd.f32 %v4591_v10, %v2067_v12  ;;  %v2264_v21 = vadd.f32 %v4591_v10, %v2131_v13  ;;  %v2068_v22 = vmul.f32 %v4059_v18, %v4586_v8  ;;  %v2132_v23 = vmul.f32 %v4123_v19, %v4586_v8  ;;  %v1165_v24 = vpop.f32.mrb[3].mxu0  ;;  %v1421_v25 = vpop.f32.mrb[3].mxu1 }
 0x106   : > { %v2198_v26 = vadd.f32 %v4591_v10, %v2065_v16  ;;  %v2262_v27 = vadd.f32 %v4591_v10, %v2129_v17  ;;  %v2066_v28 = vmul.f32 %v4586_v8, %v1165_v24  ;;  %v2130_v29 = vmul.f32 %v4586_v8, %v1421_v25 }
 0x107   : > { %v2201_v30 = vadd.f32 %v4591_v10, %v2068_v22  ;;  %v2265_v31 = vadd.f32 %v4591_v10, %v2132_v23  ;;  %v2328_v34 = vmax.f32 %v2200_v20, 0.0  ;;  %v2392_v35 = vmax.f32 %v2264_v21, 0.0 }
 0x108   : > { %v2199_v32 = vadd.f32 %v4591_v10, %v2066_v28  ;;  %v2263_v33 = vadd.f32 %v4591_v10, %v2130_v29  ;;  %v2326_v38 = vmax.f32 %v2198_v26, 0.0  ;;  %v2390_v39 = vmax.f32 %v2262_v27, 0.0 }
 0x109   : > { %v2329_v36 = vmax.f32 %v2201_v30, 0.0  ;;  %v2393_v37 = vmax.f32 %v2265_v31, 0.0 }
 0x10a   : > { %v2327_v40 = vmax.f32 %v2199_v32, 0.0  ;;  %v2391_v41 = vmax.f32 %v2263_v33, 0.0  ;;  %v4062_v42 = vpop.f32.mrb[4].mxu0  ;;  %v4126_v43 = vpop.f32.mrb[4].mxu1 }
 0x10b   : > { %v3593_v44 = vpack.c.bf16 %v2329_v36, %v2328_v34  ;;  %v3753_v45 = vpack.c.bf16 %v2393_v37, %v2392_v35  ;;  %v2071_v46 = vmul.f32 %v4062_v42, %v4586_v8  ;;  %v2135_v47 = vmul.f32 %v4126_v43, %v4586_v8  ;;  %v1178_v48 = vpop.f32.mrb[5].mxu0  ;;  %v1434_v49 = vpop.f32.mrb[5].mxu1 }
 0x10c   : > { %v3588_v50 = vpack.c.bf16 %v2327_v40, %v2326_v38  ;;  %v3748_v51 = vpack.c.bf16 %v2391_v41, %v2390_v39  ;;  %v2069_v52 = vmul.f32 %v4586_v8, %v1178_v48  ;;  %v2133_v53 = vmul.f32 %v4586_v8, %v1434_v49  ;;  %v4063_v54 = vpop.f32.mrb[6].mxu0  ;;  %v4127_v55 = vpop.f32.mrb[6].mxu1 }
 0x10d   : > { %3905 = vst [vmem:[%s4616_s9 + $0x8] sm:$0xff] %v3593_v44   ;;  %3937 = vst [vmem:[%s4616_s9 + $0x108] sm:$0xff] %v3753_v45   ;;  %v2204_v56 = vadd.f32 %v4591_v10, %v2071_v46  ;;  %v2268_v57 = vadd.f32 %v4591_v10, %v2135_v47  ;;  %v2072_v58 = vmul.f32 %v4063_v54, %v4586_v8  ;;  %v1181_v60 = vpop.f32.mrb[7].mxu0  ;;  %v1437_v61 = vpop.f32.mrb[7].mxu1 }
 0x10e   : > { %v2136_v59 = vmul.f32 %v4127_v55, %v4586_v8  ;;  %3589 = vst [vmem:[%s4616_s9] sm:$0xff] %v3588_v50   ;;  %3936 = vst [vmem:[%s4616_s9 + $0x100] sm:$0xff] %v3748_v51   ;;  %v2202_v62 = vadd.f32 %v4591_v10, %v2069_v52  ;;  %v2266_v63 = vadd.f32 %v4591_v10, %v2133_v53 }
 0x10f   : > { %v2070_v0 = vmul.f32 %v4586_v8, %v1181_v60  ;;  %v2134_v1 = vmul.f32 %v4586_v8, %v1437_v61  ;;  %v2205_v2 = vadd.f32 %v4591_v10, %v2072_v58  ;;  %v2332_v6 = vmax.f32 %v2204_v56, 0.0 }
 0x110   : > { %v2269_v3 = vadd.f32 %v4591_v10, %v2136_v59  ;;  %v2396_v7 = vmax.f32 %v2268_v57, 0.0  ;;  %v2330_v12 = vmax.f32 %v2202_v62, 0.0  ;;  %v2394_v13 = vmax.f32 %v2266_v63, 0.0 }
 0x111   : > { %v2203_v4 = vadd.f32 %v4591_v10, %v2070_v0  ;;  %v2267_v5 = vadd.f32 %v4591_v10, %v2134_v1  ;;  %v2333_v9 = vmax.f32 %v2205_v2, 0.0 }
 0x112   : > { %v2397_v11 = vmax.f32 %v2269_v3, 0.0  ;;  %v4066_v16 = vpop.f32.mrb[8].mxu0  ;;  %v4130_v17 = vpop.f32.mrb[8].mxu1 }
 0x113   : > { %v2331_v14 = vmax.f32 %v2203_v4, 0.0  ;;  %v2395_v15 = vmax.f32 %v2267_v5, 0.0  ;;  %v3603_v18 = vpack.c.bf16 %v2333_v9, %v2332_v6  ;;  %v2075_v20 = vmul.f32 %v4066_v16, %v4586_v8  ;;  %v1194_v22 = vpop.f32.mrb[9].mxu0  ;;  %v1450_v23 = vpop.f32.mrb[9].mxu1 }
 0x114   : > { %v3763_v19 = vpack.c.bf16 %v2397_v11, %v2396_v7  ;;  %v2139_v21 = vmul.f32 %v4130_v17, %v4586_v8  ;;  %v2073_v26 = vmul.f32 %v4586_v8, %v1194_v22  ;;  %v2137_v27 = vmul.f32 %v4586_v8, %v1450_v23  ;;  %v4067_v28 = vpop.f32.mrb[10].mxu0  ;;  %v4131_v29 = vpop.f32.mrb[10].mxu1 }
 0x115   : > { %v3598_v24 = vpack.c.bf16 %v2331_v14, %v2330_v12  ;;  %v3758_v25 = vpack.c.bf16 %v2395_v15, %v2394_v13  ;;  %3907 = vst [vmem:[%s4616_s9 + $0x18] sm:$0xff] %v3603_v18   ;;  %v2208_v30 = vadd.f32 %v4591_v10, %v2075_v20  ;;  %v2076_v32 = vmul.f32 %v4067_v28, %v4586_v8  ;;  %v1197_v34 = vpop.f32.mrb[11].mxu0  ;;  %v1453_v35 = vpop.f32.mrb[11].mxu1 }
 0x116   : > { %3939 = vst [vmem:[%s4616_s9 + $0x118] sm:$0xff] %v3763_v19   ;;  %v2272_v31 = vadd.f32 %v4591_v10, %v2139_v21  ;;  %v2140_v33 = vmul.f32 %v4131_v29, %v4586_v8  ;;  %v2206_v36 = vadd.f32 %v4591_v10, %v2073_v26  ;;  %v2270_v37 = vadd.f32 %v4591_v10, %v2137_v27 }
 0x117   : > { %3906 = vst [vmem:[%s4616_s9 + $0x10] sm:$0xff] %v3598_v24   ;;  %3938 = vst [vmem:[%s4616_s9 + $0x110] sm:$0xff] %v3758_v25   ;;  %v2074_v38 = vmul.f32 %v4586_v8, %v1197_v34  ;;  %v2138_v39 = vmul.f32 %v4586_v8, %v1453_v35  ;;  %v2209_v40 = vadd.f32 %v4591_v10, %v2076_v32  ;;  %v2336_v44 = vmax.f32 %v2208_v30, 0.0 }
 0x118   : > { %v2273_v41 = vadd.f32 %v4591_v10, %v2140_v33  ;;  %v2400_v45 = vmax.f32 %v2272_v31, 0.0  ;;  %v2334_v48 = vmax.f32 %v2206_v36, 0.0  ;;  %v2398_v49 = vmax.f32 %v2270_v37, 0.0 }
 0x119   : > { %v2207_v42 = vadd.f32 %v4591_v10, %v2074_v38  ;;  %v2271_v43 = vadd.f32 %v4591_v10, %v2138_v39  ;;  %v2337_v46 = vmax.f32 %v2209_v40, 0.0 }
 0x11a   : > { %v2401_v47 = vmax.f32 %v2273_v41, 0.0  ;;  %v4070_v52 = vpop.f32.mrb[12].mxu0  ;;  %v4134_v53 = vpop.f32.mrb[12].mxu1 }
 0x11b   : > { %v2335_v50 = vmax.f32 %v2207_v42, 0.0  ;;  %v2399_v51 = vmax.f32 %v2271_v43, 0.0  ;;  %v3613_v54 = vpack.c.bf16 %v2337_v46, %v2336_v44  ;;  %v2079_v56 = vmul.f32 %v4070_v52, %v4586_v8  ;;  %v1210_v58 = vpop.f32.mrb[13].mxu0  ;;  %v1466_v59 = vpop.f32.mrb[13].mxu1 }
 0x11c   : > { %v3773_v55 = vpack.c.bf16 %v2401_v47, %v2400_v45  ;;  %v2143_v57 = vmul.f32 %v4134_v53, %v4586_v8  ;;  %v2077_v62 = vmul.f32 %v4586_v8, %v1210_v58  ;;  %v2141_v63 = vmul.f32 %v4586_v8, %v1466_v59  ;;  %v4071_v0 = vpop.f32.mrb[14].mxu0  ;;  %v4135_v1 = vpop.f32.mrb[14].mxu1 }
 0x11d   : > { %v3608_v60 = vpack.c.bf16 %v2335_v50, %v2334_v48  ;;  %v3768_v61 = vpack.c.bf16 %v2399_v51, %v2398_v49  ;;  %3909 = vst [vmem:[%s4616_s9 + $0x28] sm:$0xff] %v3613_v54   ;;  %v2212_v2 = vadd.f32 %v4591_v10, %v2079_v56  ;;  %v2080_v4 = vmul.f32 %v4071_v0, %v4586_v8  ;;  %v1213_v6 = vpop.f32.mrb[15].mxu0  ;;  %v1469_v7 = vpop.f32.mrb[15].mxu1 }
 0x11e   : > { %3941 = vst [vmem:[%s4616_s9 + $0x128] sm:$0xff] %v3773_v55   ;;  %v2276_v3 = vadd.f32 %v4591_v10, %v2143_v57  ;;  %v2144_v5 = vmul.f32 %v4135_v1, %v4586_v8  ;;  %v2210_v9 = vadd.f32 %v4591_v10, %v2077_v62  ;;  %v2274_v11 = vadd.f32 %v4591_v10, %v2141_v63 }
 0x11f   : > { %3908 = vst [vmem:[%s4616_s9 + $0x20] sm:$0xff] %v3608_v60   ;;  %3940 = vst [vmem:[%s4616_s9 + $0x120] sm:$0xff] %v3768_v61   ;;  %v2078_v12 = vmul.f32 %v4586_v8, %v1213_v6  ;;  %v2142_v13 = vmul.f32 %v4586_v8, %v1469_v7  ;;  %v2213_v14 = vadd.f32 %v4591_v10, %v2080_v4  ;;  %v2340_v18 = vmax.f32 %v2212_v2, 0.0 }
 0x120   : > { %v2277_v15 = vadd.f32 %v4591_v10, %v2144_v5  ;;  %v2404_v19 = vmax.f32 %v2276_v3, 0.0  ;;  %v2338_v22 = vmax.f32 %v2210_v9, 0.0  ;;  %v2402_v23 = vmax.f32 %v2274_v11, 0.0 }
 0x121   : > { %v2211_v16 = vadd.f32 %v4591_v10, %v2078_v12  ;;  %v2275_v17 = vadd.f32 %v4591_v10, %v2142_v13  ;;  %v2341_v20 = vmax.f32 %v2213_v14, 0.0 }
 0x122   : > { %v2405_v21 = vmax.f32 %v2277_v15, 0.0  ;;  %v4074_v26 = vpop.f32.mrb[16].mxu0  ;;  %v4138_v27 = vpop.f32.mrb[16].mxu1 }
 0x123   : > { %v2339_v24 = vmax.f32 %v2211_v16, 0.0  ;;  %v2403_v25 = vmax.f32 %v2275_v17, 0.0  ;;  %v3623_v28 = vpack.c.bf16 %v2341_v20, %v2340_v18  ;;  %v2083_v30 = vmul.f32 %v4074_v26, %v4586_v8  ;;  %v1226_v32 = vpop.f32.mrb[17].mxu0  ;;  %v1482_v33 = vpop.f32.mrb[17].mxu1 }
 0x124   : > { %v3783_v29 = vpack.c.bf16 %v2405_v21, %v2404_v19  ;;  %v2147_v31 = vmul.f32 %v4138_v27, %v4586_v8  ;;  %v2081_v36 = vmul.f32 %v4586_v8, %v1226_v32  ;;  %v2145_v37 = vmul.f32 %v4586_v8, %v1482_v33  ;;  %v4075_v38 = vpop.f32.mrb[18].mxu0  ;;  %v4139_v39 = vpop.f32.mrb[18].mxu1 }
 0x125   : > { %v3618_v34 = vpack.c.bf16 %v2339_v24, %v2338_v22  ;;  %v3778_v35 = vpack.c.bf16 %v2403_v25, %v2402_v23  ;;  %3911 = vst [vmem:[%s4616_s9 + $0x38] sm:$0xff] %v3623_v28   ;;  %v2216_v40 = vadd.f32 %v4591_v10, %v2083_v30  ;;  %v2084_v42 = vmul.f32 %v4075_v38, %v4586_v8  ;;  %v1229_v44 = vpop.f32.mrb[19].mxu0  ;;  %v1485_v45 = vpop.f32.mrb[19].mxu1 }
 0x126   : > { %3943 = vst [vmem:[%s4616_s9 + $0x138] sm:$0xff] %v3783_v29   ;;  %v2280_v41 = vadd.f32 %v4591_v10, %v2147_v31  ;;  %v2148_v43 = vmul.f32 %v4139_v39, %v4586_v8  ;;  %v2214_v46 = vadd.f32 %v4591_v10, %v2081_v36  ;;  %v2278_v47 = vadd.f32 %v4591_v10, %v2145_v37 }
 0x127   : > { %3910 = vst [vmem:[%s4616_s9 + $0x30] sm:$0xff] %v3618_v34   ;;  %3942 = vst [vmem:[%s4616_s9 + $0x130] sm:$0xff] %v3778_v35   ;;  %v2082_v48 = vmul.f32 %v4586_v8, %v1229_v44  ;;  %v2146_v49 = vmul.f32 %v4586_v8, %v1485_v45  ;;  %v2217_v50 = vadd.f32 %v4591_v10, %v2084_v42  ;;  %v2344_v54 = vmax.f32 %v2216_v40, 0.0 }
 0x128   : > { %v2281_v51 = vadd.f32 %v4591_v10, %v2148_v43  ;;  %v2408_v55 = vmax.f32 %v2280_v41, 0.0  ;;  %v2342_v58 = vmax.f32 %v2214_v46, 0.0  ;;  %v2406_v59 = vmax.f32 %v2278_v47, 0.0 }
 0x129   : > { %v2215_v52 = vadd.f32 %v4591_v10, %v2082_v48  ;;  %v2279_v53 = vadd.f32 %v4591_v10, %v2146_v49  ;;  %v2345_v56 = vmax.f32 %v2217_v50, 0.0 }
 0x12a   : > { %v2409_v57 = vmax.f32 %v2281_v51, 0.0  ;;  %v4078_v62 = vpop.f32.mrb[20].mxu0  ;;  %v4142_v63 = vpop.f32.mrb[20].mxu1 }
 0x12b   : > { %v2343_v60 = vmax.f32 %v2215_v52, 0.0  ;;  %v2407_v61 = vmax.f32 %v2279_v53, 0.0  ;;  %v3633_v0 = vpack.c.bf16 %v2345_v56, %v2344_v54  ;;  %v2087_v2 = vmul.f32 %v4078_v62, %v4586_v8  ;;  %v1242_v4 = vpop.f32.mrb[21].mxu0  ;;  %v1498_v5 = vpop.f32.mrb[21].mxu1 }
 0x12c   : > { %v3793_v1 = vpack.c.bf16 %v2409_v57, %v2408_v55  ;;  %v2151_v3 = vmul.f32 %v4142_v63, %v4586_v8  ;;  %v2085_v9 = vmul.f32 %v4586_v8, %v1242_v4  ;;  %v2149_v11 = vmul.f32 %v4586_v8, %v1498_v5  ;;  %v4079_v12 = vpop.f32.mrb[22].mxu0  ;;  %v4143_v13 = vpop.f32.mrb[22].mxu1 }
 0x12d   : > { %v3628_v6 = vpack.c.bf16 %v2343_v60, %v2342_v58  ;;  %v3788_v7 = vpack.c.bf16 %v2407_v61, %v2406_v59  ;;  %3913 = vst [vmem:[%s4616_s9 + $0x48] sm:$0xff] %v3633_v0   ;;  %v2220_v14 = vadd.f32 %v4591_v10, %v2087_v2  ;;  %v2088_v16 = vmul.f32 %v4079_v12, %v4586_v8  ;;  %v1245_v18 = vpop.f32.mrb[23].mxu0  ;;  %v1501_v19 = vpop.f32.mrb[23].mxu1 }
 0x12e   : > { %3945 = vst [vmem:[%s4616_s9 + $0x148] sm:$0xff] %v3793_v1   ;;  %v2284_v15 = vadd.f32 %v4591_v10, %v2151_v3  ;;  %v2152_v17 = vmul.f32 %v4143_v13, %v4586_v8  ;;  %v2218_v20 = vadd.f32 %v4591_v10, %v2085_v9  ;;  %v2282_v21 = vadd.f32 %v4591_v10, %v2149_v11 }
 0x12f   : > { %3912 = vst [vmem:[%s4616_s9 + $0x40] sm:$0xff] %v3628_v6   ;;  %3944 = vst [vmem:[%s4616_s9 + $0x140] sm:$0xff] %v3788_v7   ;;  %v2086_v22 = vmul.f32 %v4586_v8, %v1245_v18  ;;  %v2150_v23 = vmul.f32 %v4586_v8, %v1501_v19  ;;  %v2221_v24 = vadd.f32 %v4591_v10, %v2088_v16  ;;  %v2348_v28 = vmax.f32 %v2220_v14, 0.0 }
 0x130   : > { %v2285_v25 = vadd.f32 %v4591_v10, %v2152_v17  ;;  %v2412_v29 = vmax.f32 %v2284_v15, 0.0  ;;  %v2346_v32 = vmax.f32 %v2218_v20, 0.0  ;;  %v2410_v33 = vmax.f32 %v2282_v21, 0.0 }
 0x131   : > { %v2219_v26 = vadd.f32 %v4591_v10, %v2086_v22  ;;  %v2283_v27 = vadd.f32 %v4591_v10, %v2150_v23  ;;  %v2349_v30 = vmax.f32 %v2221_v24, 0.0 }
 0x132   : > { %v2413_v31 = vmax.f32 %v2285_v25, 0.0  ;;  %v4082_v36 = vpop.f32.mrb[24].mxu0  ;;  %v4146_v37 = vpop.f32.mrb[24].mxu1 }
 0x133   : > { %v2347_v34 = vmax.f32 %v2219_v26, 0.0  ;;  %v2411_v35 = vmax.f32 %v2283_v27, 0.0  ;;  %v3643_v38 = vpack.c.bf16 %v2349_v30, %v2348_v28  ;;  %v2091_v40 = vmul.f32 %v4082_v36, %v4586_v8  ;;  %v1258_v42 = vpop.f32.mrb[25].mxu0  ;;  %v1514_v43 = vpop.f32.mrb[25].mxu1 }
 0x134   : > { %v3803_v39 = vpack.c.bf16 %v2413_v31, %v2412_v29  ;;  %v2155_v41 = vmul.f32 %v4146_v37, %v4586_v8  ;;  %v2089_v46 = vmul.f32 %v4586_v8, %v1258_v42  ;;  %v2153_v47 = vmul.f32 %v4586_v8, %v1514_v43  ;;  %v4083_v48 = vpop.f32.mrb[26].mxu0  ;;  %v4147_v49 = vpop.f32.mrb[26].mxu1 }
 0x135   : > { %v3638_v44 = vpack.c.bf16 %v2347_v34, %v2346_v32  ;;  %v3798_v45 = vpack.c.bf16 %v2411_v35, %v2410_v33  ;;  %3915 = vst [vmem:[%s4616_s9 + $0x58] sm:$0xff] %v3643_v38   ;;  %v2224_v50 = vadd.f32 %v4591_v10, %v2091_v40  ;;  %v2092_v52 = vmul.f32 %v4083_v48, %v4586_v8  ;;  %v1261_v54 = vpop.f32.mrb[27].mxu0  ;;  %v1517_v55 = vpop.f32.mrb[27].mxu1 }
 0x136   : > { %3947 = vst [vmem:[%s4616_s9 + $0x158] sm:$0xff] %v3803_v39   ;;  %v2288_v51 = vadd.f32 %v4591_v10, %v2155_v41  ;;  %v2156_v53 = vmul.f32 %v4147_v49, %v4586_v8  ;;  %v2222_v56 = vadd.f32 %v4591_v10, %v2089_v46  ;;  %v2286_v57 = vadd.f32 %v4591_v10, %v2153_v47 }
 0x137   : > { %3914 = vst [vmem:[%s4616_s9 + $0x50] sm:$0xff] %v3638_v44   ;;  %3946 = vst [vmem:[%s4616_s9 + $0x150] sm:$0xff] %v3798_v45   ;;  %v2090_v58 = vmul.f32 %v4586_v8, %v1261_v54  ;;  %v2154_v59 = vmul.f32 %v4586_v8, %v1517_v55  ;;  %v2225_v60 = vadd.f32 %v4591_v10, %v2092_v52  ;;  %v2352_v0 = vmax.f32 %v2224_v50, 0.0 }
 0x138   : > { %v2289_v61 = vadd.f32 %v4591_v10, %v2156_v53  ;;  %v2416_v1 = vmax.f32 %v2288_v51, 0.0  ;;  %v2350_v4 = vmax.f32 %v2222_v56, 0.0  ;;  %v2414_v5 = vmax.f32 %v2286_v57, 0.0 }
 0x139   : > { %v2223_v62 = vadd.f32 %v4591_v10, %v2090_v58  ;;  %v2287_v63 = vadd.f32 %v4591_v10, %v2154_v59  ;;  %v2353_v2 = vmax.f32 %v2225_v60, 0.0 }
 0x13a   : > { %v2417_v3 = vmax.f32 %v2289_v61, 0.0  ;;  %v4086_v9 = vpop.f32.mrb[28].mxu0  ;;  %v4150_v11 = vpop.f32.mrb[28].mxu1 }
 0x13b   : > { %v2351_v6 = vmax.f32 %v2223_v62, 0.0  ;;  %v2415_v7 = vmax.f32 %v2287_v63, 0.0  ;;  %v3653_v12 = vpack.c.bf16 %v2353_v2, %v2352_v0  ;;  %v2095_v14 = vmul.f32 %v4086_v9, %v4586_v8  ;;  %v1274_v16 = vpop.f32.mrb[29].mxu0  ;;  %v1530_v17 = vpop.f32.mrb[29].mxu1 }
 0x13c   : > { %v3813_v13 = vpack.c.bf16 %v2417_v3, %v2416_v1  ;;  %v2159_v15 = vmul.f32 %v4150_v11, %v4586_v8  ;;  %v2093_v20 = vmul.f32 %v4586_v8, %v1274_v16  ;;  %v2157_v21 = vmul.f32 %v4586_v8, %v1530_v17  ;;  %v4087_v22 = vpop.f32.mrb[30].mxu0  ;;  %v4151_v23 = vpop.f32.mrb[30].mxu1 }
 0x13d   : > { %v3648_v18 = vpack.c.bf16 %v2351_v6, %v2350_v4  ;;  %v3808_v19 = vpack.c.bf16 %v2415_v7, %v2414_v5  ;;  %3917 = vst [vmem:[%s4616_s9 + $0x68] sm:$0xff] %v3653_v12   ;;  %v2228_v24 = vadd.f32 %v4591_v10, %v2095_v14  ;;  %v2096_v26 = vmul.f32 %v4087_v22, %v4586_v8  ;;  %v1277_v28 = vpop.f32.mrb[31].mxu0  ;;  %v1533_v29 = vpop.f32.mrb[31].mxu1 }
 0x13e   : > { %3949 = vst [vmem:[%s4616_s9 + $0x168] sm:$0xff] %v3813_v13   ;;  %v2292_v25 = vadd.f32 %v4591_v10, %v2159_v15  ;;  %v2160_v27 = vmul.f32 %v4151_v23, %v4586_v8  ;;  %v2226_v30 = vadd.f32 %v4591_v10, %v2093_v20  ;;  %v2290_v31 = vadd.f32 %v4591_v10, %v2157_v21 }
 0x13f   : > { %3916 = vst [vmem:[%s4616_s9 + $0x60] sm:$0xff] %v3648_v18   ;;  %3948 = vst [vmem:[%s4616_s9 + $0x160] sm:$0xff] %v3808_v19   ;;  %v2094_v32 = vmul.f32 %v4586_v8, %v1277_v28  ;;  %v2158_v33 = vmul.f32 %v4586_v8, %v1533_v29  ;;  %v2229_v34 = vadd.f32 %v4591_v10, %v2096_v26  ;;  %v2356_v38 = vmax.f32 %v2228_v24, 0.0 }
 0x140   : > { %v2293_v35 = vadd.f32 %v4591_v10, %v2160_v27  ;;  %v2420_v39 = vmax.f32 %v2292_v25, 0.0  ;;  %v2354_v42 = vmax.f32 %v2226_v30, 0.0  ;;  %v2418_v43 = vmax.f32 %v2290_v31, 0.0 }
 0x141   : > { %v2227_v36 = vadd.f32 %v4591_v10, %v2094_v32  ;;  %v2291_v37 = vadd.f32 %v4591_v10, %v2158_v33  ;;  %v2357_v40 = vmax.f32 %v2229_v34, 0.0 }
 0x142   : > { %v2421_v41 = vmax.f32 %v2293_v35, 0.0  ;;  %v4090_v46 = vpop.f32.mrb[32].mxu0  ;;  %v4154_v47 = vpop.f32.mrb[32].mxu1 }
 0x143   : > { %v2355_v44 = vmax.f32 %v2227_v36, 0.0  ;;  %v2419_v45 = vmax.f32 %v2291_v37, 0.0  ;;  %v3663_v48 = vpack.c.bf16 %v2357_v40, %v2356_v38  ;;  %v2099_v50 = vmul.f32 %v4090_v46, %v4586_v8  ;;  %v1290_v52 = vpop.f32.mrb[33].mxu0  ;;  %v1546_v53 = vpop.f32.mrb[33].mxu1 }
 0x144   : > { %v3823_v49 = vpack.c.bf16 %v2421_v41, %v2420_v39  ;;  %v2163_v51 = vmul.f32 %v4154_v47, %v4586_v8  ;;  %v2097_v56 = vmul.f32 %v4586_v8, %v1290_v52  ;;  %v2161_v57 = vmul.f32 %v4586_v8, %v1546_v53  ;;  %v4091_v58 = vpop.f32.mrb[34].mxu0  ;;  %v4155_v59 = vpop.f32.mrb[34].mxu1 }
 0x145   : > { %v3658_v54 = vpack.c.bf16 %v2355_v44, %v2354_v42  ;;  %v3818_v55 = vpack.c.bf16 %v2419_v45, %v2418_v43  ;;  %3919 = vst [vmem:[%s4616_s9 + $0x78] sm:$0xff] %v3663_v48   ;;  %v2232_v60 = vadd.f32 %v4591_v10, %v2099_v50  ;;  %v2100_v62 = vmul.f32 %v4091_v58, %v4586_v8  ;;  %v1293_v0 = vpop.f32.mrb[35].mxu0  ;;  %v1549_v1 = vpop.f32.mrb[35].mxu1 }
 0x146   : > { %3951 = vst [vmem:[%s4616_s9 + $0x178] sm:$0xff] %v3823_v49   ;;  %v2296_v61 = vadd.f32 %v4591_v10, %v2163_v51  ;;  %v2164_v63 = vmul.f32 %v4155_v59, %v4586_v8  ;;  %v2230_v2 = vadd.f32 %v4591_v10, %v2097_v56  ;;  %v2294_v3 = vadd.f32 %v4591_v10, %v2161_v57 }
 0x147   : > { %3918 = vst [vmem:[%s4616_s9 + $0x70] sm:$0xff] %v3658_v54   ;;  %3950 = vst [vmem:[%s4616_s9 + $0x170] sm:$0xff] %v3818_v55   ;;  %v2098_v4 = vmul.f32 %v4586_v8, %v1293_v0  ;;  %v2162_v5 = vmul.f32 %v4586_v8, %v1549_v1  ;;  %v2233_v6 = vadd.f32 %v4591_v10, %v2100_v62  ;;  %v2360_v12 = vmax.f32 %v2232_v60, 0.0 }
 0x148   : > { %v2297_v7 = vadd.f32 %v4591_v10, %v2164_v63  ;;  %v2424_v13 = vmax.f32 %v2296_v61, 0.0  ;;  %v2358_v16 = vmax.f32 %v2230_v2, 0.0  ;;  %v2422_v17 = vmax.f32 %v2294_v3, 0.0 }
 0x149   : > { %v2231_v9 = vadd.f32 %v4591_v10, %v2098_v4  ;;  %v2295_v11 = vadd.f32 %v4591_v10, %v2162_v5  ;;  %v2361_v14 = vmax.f32 %v2233_v6, 0.0 }
 0x14a   : > { %v2425_v15 = vmax.f32 %v2297_v7, 0.0  ;;  %v4094_v20 = vpop.f32.mrb[36].mxu0  ;;  %v4158_v21 = vpop.f32.mrb[36].mxu1 }
 0x14b   : > { %v2359_v18 = vmax.f32 %v2231_v9, 0.0  ;;  %v2423_v19 = vmax.f32 %v2295_v11, 0.0  ;;  %v3673_v22 = vpack.c.bf16 %v2361_v14, %v2360_v12  ;;  %v2103_v24 = vmul.f32 %v4094_v20, %v4586_v8  ;;  %v1306_v26 = vpop.f32.mrb[37].mxu0  ;;  %v1562_v27 = vpop.f32.mrb[37].mxu1 }
 0x14c   : > { %v3833_v23 = vpack.c.bf16 %v2425_v15, %v2424_v13  ;;  %v2167_v25 = vmul.f32 %v4158_v21, %v4586_v8  ;;  %v2101_v30 = vmul.f32 %v4586_v8, %v1306_v26  ;;  %v2165_v31 = vmul.f32 %v4586_v8, %v1562_v27  ;;  %v4095_v32 = vpop.f32.mrb[38].mxu0  ;;  %v4159_v33 = vpop.f32.mrb[38].mxu1 }
 0x14d   : > { %v3668_v28 = vpack.c.bf16 %v2359_v18, %v2358_v16  ;;  %v3828_v29 = vpack.c.bf16 %v2423_v19, %v2422_v17  ;;  %3921 = vst [vmem:[%s4616_s9 + $0x88] sm:$0xff] %v3673_v22   ;;  %v2236_v34 = vadd.f32 %v4591_v10, %v2103_v24  ;;  %v2104_v36 = vmul.f32 %v4095_v32, %v4586_v8  ;;  %v1309_v38 = vpop.f32.mrb[39].mxu0  ;;  %v1565_v39 = vpop.f32.mrb[39].mxu1 }
 0x14e   : > { %3953 = vst [vmem:[%s4616_s9 + $0x188] sm:$0xff] %v3833_v23   ;;  %v2300_v35 = vadd.f32 %v4591_v10, %v2167_v25  ;;  %v2168_v37 = vmul.f32 %v4159_v33, %v4586_v8  ;;  %v2234_v40 = vadd.f32 %v4591_v10, %v2101_v30  ;;  %v2298_v41 = vadd.f32 %v4591_v10, %v2165_v31 }
 0x14f   : > { %3920 = vst [vmem:[%s4616_s9 + $0x80] sm:$0xff] %v3668_v28   ;;  %3952 = vst [vmem:[%s4616_s9 + $0x180] sm:$0xff] %v3828_v29   ;;  %v2102_v42 = vmul.f32 %v4586_v8, %v1309_v38  ;;  %v2166_v43 = vmul.f32 %v4586_v8, %v1565_v39  ;;  %v2237_v44 = vadd.f32 %v4591_v10, %v2104_v36  ;;  %v2364_v48 = vmax.f32 %v2236_v34, 0.0 }
 0x150   : > { %v2301_v45 = vadd.f32 %v4591_v10, %v2168_v37  ;;  %v2428_v49 = vmax.f32 %v2300_v35, 0.0  ;;  %v2362_v52 = vmax.f32 %v2234_v40, 0.0  ;;  %v2426_v53 = vmax.f32 %v2298_v41, 0.0 }
 0x151   : > { %v2235_v46 = vadd.f32 %v4591_v10, %v2102_v42  ;;  %v2299_v47 = vadd.f32 %v4591_v10, %v2166_v43  ;;  %v2365_v50 = vmax.f32 %v2237_v44, 0.0 }
 0x152   : > { %v2429_v51 = vmax.f32 %v2301_v45, 0.0  ;;  %v4098_v56 = vpop.f32.mrb[40].mxu0  ;;  %v4162_v57 = vpop.f32.mrb[40].mxu1 }
 0x153   : > { %v2363_v54 = vmax.f32 %v2235_v46, 0.0  ;;  %v2427_v55 = vmax.f32 %v2299_v47, 0.0  ;;  %v3683_v58 = vpack.c.bf16 %v2365_v50, %v2364_v48  ;;  %v2107_v60 = vmul.f32 %v4098_v56, %v4586_v8  ;;  %v1322_v62 = vpop.f32.mrb[41].mxu0  ;;  %v1578_v63 = vpop.f32.mrb[41].mxu1 }
 0x154   : > { %v3843_v59 = vpack.c.bf16 %v2429_v51, %v2428_v49  ;;  %v2171_v61 = vmul.f32 %v4162_v57, %v4586_v8  ;;  %v2105_v2 = vmul.f32 %v4586_v8, %v1322_v62  ;;  %v2169_v3 = vmul.f32 %v4586_v8, %v1578_v63  ;;  %v4099_v4 = vpop.f32.mrb[42].mxu0  ;;  %v4163_v5 = vpop.f32.mrb[42].mxu1 }
 0x155   : > { %v3678_v0 = vpack.c.bf16 %v2363_v54, %v2362_v52  ;;  %v3838_v1 = vpack.c.bf16 %v2427_v55, %v2426_v53  ;;  %3923 = vst [vmem:[%s4616_s9 + $0x98] sm:$0xff] %v3683_v58   ;;  %v2240_v6 = vadd.f32 %v4591_v10, %v2107_v60  ;;  %v2108_v9 = vmul.f32 %v4099_v4, %v4586_v8  ;;  %v1325_v12 = vpop.f32.mrb[43].mxu0  ;;  %v1581_v13 = vpop.f32.mrb[43].mxu1 }
 0x156   : > { %3955 = vst [vmem:[%s4616_s9 + $0x198] sm:$0xff] %v3843_v59   ;;  %v2304_v7 = vadd.f32 %v4591_v10, %v2171_v61  ;;  %v2172_v11 = vmul.f32 %v4163_v5, %v4586_v8  ;;  %v2238_v14 = vadd.f32 %v4591_v10, %v2105_v2  ;;  %v2302_v15 = vadd.f32 %v4591_v10, %v2169_v3 }
 0x157   : > { %3922 = vst [vmem:[%s4616_s9 + $0x90] sm:$0xff] %v3678_v0   ;;  %3954 = vst [vmem:[%s4616_s9 + $0x190] sm:$0xff] %v3838_v1   ;;  %v2106_v16 = vmul.f32 %v4586_v8, %v1325_v12  ;;  %v2170_v17 = vmul.f32 %v4586_v8, %v1581_v13  ;;  %v2241_v18 = vadd.f32 %v4591_v10, %v2108_v9  ;;  %v2368_v22 = vmax.f32 %v2240_v6, 0.0 }
 0x158   : > { %v2305_v19 = vadd.f32 %v4591_v10, %v2172_v11  ;;  %v2432_v23 = vmax.f32 %v2304_v7, 0.0  ;;  %v2366_v26 = vmax.f32 %v2238_v14, 0.0  ;;  %v2430_v27 = vmax.f32 %v2302_v15, 0.0 }
 0x159   : > { %v2239_v20 = vadd.f32 %v4591_v10, %v2106_v16  ;;  %v2303_v21 = vadd.f32 %v4591_v10, %v2170_v17  ;;  %v2369_v24 = vmax.f32 %v2241_v18, 0.0 }
 0x15a   : > { %v2433_v25 = vmax.f32 %v2305_v19, 0.0  ;;  %v4102_v30 = vpop.f32.mrb[44].mxu0  ;;  %v4166_v31 = vpop.f32.mrb[44].mxu1 }
 0x15b   : > { %v2367_v28 = vmax.f32 %v2239_v20, 0.0  ;;  %v2431_v29 = vmax.f32 %v2303_v21, 0.0  ;;  %v3693_v32 = vpack.c.bf16 %v2369_v24, %v2368_v22  ;;  %v2111_v34 = vmul.f32 %v4102_v30, %v4586_v8  ;;  %v1338_v36 = vpop.f32.mrb[45].mxu0  ;;  %v1594_v37 = vpop.f32.mrb[45].mxu1 }
 0x15c   : > { %v3853_v33 = vpack.c.bf16 %v2433_v25, %v2432_v23  ;;  %v2175_v35 = vmul.f32 %v4166_v31, %v4586_v8  ;;  %v2109_v40 = vmul.f32 %v4586_v8, %v1338_v36  ;;  %v2173_v41 = vmul.f32 %v4586_v8, %v1594_v37  ;;  %v4103_v42 = vpop.f32.mrb[46].mxu0  ;;  %v4167_v43 = vpop.f32.mrb[46].mxu1 }
 0x15d   : > { %v3688_v38 = vpack.c.bf16 %v2367_v28, %v2366_v26  ;;  %v3848_v39 = vpack.c.bf16 %v2431_v29, %v2430_v27  ;;  %3925 = vst [vmem:[%s4616_s9 + $0xa8] sm:$0xff] %v3693_v32   ;;  %v2244_v44 = vadd.f32 %v4591_v10, %v2111_v34  ;;  %v2112_v46 = vmul.f32 %v4103_v42, %v4586_v8  ;;  %v1341_v48 = vpop.f32.mrb[47].mxu0  ;;  %v1597_v49 = vpop.f32.mrb[47].mxu1 }
 0x15e   : > { %3957 = vst [vmem:[%s4616_s9 + $0x1a8] sm:$0xff] %v3853_v33   ;;  %v2308_v45 = vadd.f32 %v4591_v10, %v2175_v35  ;;  %v2176_v47 = vmul.f32 %v4167_v43, %v4586_v8  ;;  %v2242_v50 = vadd.f32 %v4591_v10, %v2109_v40  ;;  %v2306_v51 = vadd.f32 %v4591_v10, %v2173_v41  ;;  %v4857_v43 = vld [vmem:[%s4987_s2] ss:$0 sm:$0xff] }
 0x15f   : > { %3924 = vst [vmem:[%s4616_s9 + $0xa0] sm:$0xff] %v3688_v38   ;;  %3956 = vst [vmem:[%s4616_s9 + $0x1a0] sm:$0xff] %v3848_v39   ;;  %v2110_v52 = vmul.f32 %v4586_v8, %v1341_v48  ;;  %v2174_v53 = vmul.f32 %v4586_v8, %v1597_v49  ;;  %v2245_v54 = vadd.f32 %v4591_v10, %v2112_v46  ;;  %v2372_v58 = vmax.f32 %v2244_v44, 0.0 }
 0x160   : > { %v2309_v55 = vadd.f32 %v4591_v10, %v2176_v47  ;;  %v2436_v59 = vmax.f32 %v2308_v45, 0.0  ;;  %v2370_v62 = vmax.f32 %v2242_v50, 0.0  ;;  %v2434_v63 = vmax.f32 %v2306_v51, 0.0 }
 0x161   : > { %v2243_v56 = vadd.f32 %v4591_v10, %v2110_v52  ;;  %v2307_v57 = vadd.f32 %v4591_v10, %v2174_v53  ;;  %v2373_v60 = vmax.f32 %v2245_v54, 0.0  ;;  %v4868_v53 = vld [vmem:[%s4987_s2 + $0x1] ss:$0 sm:$0xff] }
 0x162   : > { %v2437_v61 = vmax.f32 %v2309_v55, 0.0  ;;  %v4106_v2 = vpop.f32.mrb[48].mxu0  ;;  %v4170_v3 = vpop.f32.mrb[48].mxu1 }
 0x163   : > { %v2371_v0 = vmax.f32 %v2243_v56, 0.0  ;;  %v2435_v1 = vmax.f32 %v2307_v57, 0.0  ;;  %v3703_v4 = vpack.c.bf16 %v2373_v60, %v2372_v58  ;;  %v2115_v6 = vmul.f32 %v4106_v2, %v4586_v8  ;;  %v1354_v9 = vpop.f32.mrb[49].mxu0  ;;  %v1610_v11 = vpop.f32.mrb[49].mxu1 }
 0x164   : > { %v3863_v5 = vpack.c.bf16 %v2437_v61, %v2436_v59  ;;  %v2179_v7 = vmul.f32 %v4170_v3, %v4586_v8  ;;  %v2113_v14 = vmul.f32 %v4586_v8, %v1354_v9  ;;  %v2177_v15 = vmul.f32 %v4586_v8, %v1610_v11  ;;  %v4107_v16 = vpop.f32.mrb[50].mxu0  ;;  %v4171_v17 = vpop.f32.mrb[50].mxu1 }
 0x165   : > { %v3698_v12 = vpack.c.bf16 %v2371_v0, %v2370_v62  ;;  %v3858_v13 = vpack.c.bf16 %v2435_v1, %v2434_v63  ;;  %3927 = vst [vmem:[%s4616_s9 + $0xb8] sm:$0xff] %v3703_v4   ;;  %v2248_v18 = vadd.f32 %v4591_v10, %v2115_v6  ;;  %v2116_v20 = vmul.f32 %v4107_v16, %v4586_v8  ;;  %v1357_v22 = vpop.f32.mrb[51].mxu0  ;;  %v1613_v23 = vpop.f32.mrb[51].mxu1 }
 0x166   : > { %3959 = vst [vmem:[%s4616_s9 + $0x1b8] sm:$0xff] %v3863_v5   ;;  %v2312_v19 = vadd.f32 %v4591_v10, %v2179_v7  ;;  %v2180_v21 = vmul.f32 %v4171_v17, %v4586_v8  ;;  %v2246_v24 = vadd.f32 %v4591_v10, %v2113_v14  ;;  %v2310_v25 = vadd.f32 %v4591_v10, %v2177_v15 }
 0x167   : > { %3926 = vst [vmem:[%s4616_s9 + $0xb0] sm:$0xff] %v3698_v12   ;;  %3958 = vst [vmem:[%s4616_s9 + $0x1b0] sm:$0xff] %v3858_v13   ;;  %v2114_v26 = vmul.f32 %v4586_v8, %v1357_v22  ;;  %v2178_v27 = vmul.f32 %v4586_v8, %v1613_v23  ;;  %v2249_v28 = vadd.f32 %v4591_v10, %v2116_v20  ;;  %v2376_v32 = vmax.f32 %v2248_v18, 0.0 }
 0x168   : > { %v2313_v29 = vadd.f32 %v4591_v10, %v2180_v21  ;;  %v2440_v33 = vmax.f32 %v2312_v19, 0.0  ;;  %v2374_v36 = vmax.f32 %v2246_v24, 0.0  ;;  %v2438_v37 = vmax.f32 %v2310_v25, 0.0 }
 0x169   : > { %v2247_v30 = vadd.f32 %v4591_v10, %v2114_v26  ;;  %v2311_v31 = vadd.f32 %v4591_v10, %v2178_v27  ;;  %v2377_v34 = vmax.f32 %v2249_v28, 0.0 }
 0x16a   : > { %v2441_v35 = vmax.f32 %v2313_v29, 0.0  ;;  %v4110_v40 = vpop.f32.mrb[52].mxu0  ;;  %v4174_v8 = vpop.f32.mrb[52].mxu1 }
 0x16b   : > { %v2375_v38 = vmax.f32 %v2247_v30, 0.0  ;;  %v2439_v39 = vmax.f32 %v2311_v31, 0.0  ;;  %v3713_v41 = vpack.c.bf16 %v2377_v34, %v2376_v32  ;;  %v2119_v10 = vmul.f32 %v4857_v43, %v4110_v40  ;;  %v1370_v45 = vpop.f32.mrb[53].mxu0  ;;  %v1626_v46 = vpop.f32.mrb[53].mxu1 }
 0x16c   : > { %v3873_v42 = vpack.c.bf16 %v2441_v35, %v2440_v33  ;;  %v2183_v44 = vmul.f32 %v4857_v43, %v4174_v8  ;;  %v2117_v49 = vmul.f32 %v4857_v43, %v1370_v45  ;;  %v2181_v50 = vmul.f32 %v4857_v43, %v1626_v46  ;;  %v4111_v51 = vpop.f32.mrb[54].mxu0  ;;  %v4175_v52 = vpop.f32.mrb[54].mxu1 }
 0x16d   : > { %v3708_v47 = vpack.c.bf16 %v2375_v38, %v2374_v36  ;;  %v3868_v48 = vpack.c.bf16 %v2439_v39, %v2438_v37  ;;  %3929 = vst [vmem:[%s4616_s9 + $0xc8] sm:$0xff] %v3713_v41   ;;  %v2252_v54 = vadd.f32 %v4868_v53, %v2119_v10  ;;  %v2120_v56 = vmul.f32 %v4857_v43, %v4111_v51  ;;  %v1373_v58 = vpop.f32.mrb[55].mxu0  ;;  %v1629_v59 = vpop.f32.mrb[55].mxu1 }
 0x16e   : > { %3961 = vst [vmem:[%s4616_s9 + $0x1c8] sm:$0xff] %v3873_v42   ;;  %v2316_v55 = vadd.f32 %v4868_v53, %v2183_v44  ;;  %v2184_v57 = vmul.f32 %v4857_v43, %v4175_v52  ;;  %v2250_v60 = vadd.f32 %v4868_v53, %v2117_v49  ;;  %v2314_v61 = vadd.f32 %v4868_v53, %v2181_v50 }
 0x16f   : > { %3928 = vst [vmem:[%s4616_s9 + $0xc0] sm:$0xff] %v3708_v47   ;;  %3960 = vst [vmem:[%s4616_s9 + $0x1c0] sm:$0xff] %v3868_v48   ;;  %v2118_v62 = vmul.f32 %v4857_v43, %v1373_v58  ;;  %v2182_v63 = vmul.f32 %v4857_v43, %v1629_v59  ;;  %v2253_v0 = vadd.f32 %v4868_v53, %v2120_v56  ;;  %v2380_v4 = vmax.f32 %v2252_v54, 0.0 }
 0x170   : > { %v2317_v1 = vadd.f32 %v4868_v53, %v2184_v57  ;;  %v2444_v5 = vmax.f32 %v2316_v55, 0.0  ;;  %v2378_v9 = vmax.f32 %v2250_v60, 0.0  ;;  %v2442_v11 = vmax.f32 %v2314_v61, 0.0 }
 0x171   : > { %v2251_v2 = vadd.f32 %v4868_v53, %v2118_v62  ;;  %v2315_v3 = vadd.f32 %v4868_v53, %v2182_v63  ;;  %v2381_v6 = vmax.f32 %v2253_v0, 0.0 }
 0x172   : > { %v2445_v7 = vmax.f32 %v2317_v1, 0.0  ;;  %v4114_v14 = vpop.f32.mrb[56].mxu0  ;;  %v4178_v15 = vpop.f32.mrb[56].mxu1 }
 0x173   : > { %v2379_v12 = vmax.f32 %v2251_v2, 0.0  ;;  %v2443_v13 = vmax.f32 %v2315_v3, 0.0  ;;  %v3723_v16 = vpack.c.bf16 %v2381_v6, %v2380_v4  ;;  %v2123_v18 = vmul.f32 %v4857_v43, %v4114_v14  ;;  %v1386_v20 = vpop.f32.mrb[57].mxu0  ;;  %v1642_v21 = vpop.f32.mrb[57].mxu1 }
 0x174   : > { %v3883_v17 = vpack.c.bf16 %v2445_v7, %v2444_v5  ;;  %v2187_v19 = vmul.f32 %v4857_v43, %v4178_v15  ;;  %v2121_v24 = vmul.f32 %v4857_v43, %v1386_v20  ;;  %v2185_v25 = vmul.f32 %v4857_v43, %v1642_v21  ;;  %v4115_v26 = vpop.f32.mrb[58].mxu0  ;;  %v4179_v27 = vpop.f32.mrb[58].mxu1 }
 0x175   : > { %v3718_v22 = vpack.c.bf16 %v2379_v12, %v2378_v9  ;;  %v3878_v23 = vpack.c.bf16 %v2443_v13, %v2442_v11  ;;  %3931 = vst [vmem:[%s4616_s9 + $0xd8] sm:$0xff] %v3723_v16   ;;  %v2256_v28 = vadd.f32 %v4868_v53, %v2123_v18  ;;  %v2124_v30 = vmul.f32 %v4857_v43, %v4115_v26  ;;  %v1389_v32 = vpop.f32.mrb[59].mxu0  ;;  %v1645_v33 = vpop.f32.mrb[59].mxu1 }
 0x176   : > { %3963 = vst [vmem:[%s4616_s9 + $0x1d8] sm:$0xff] %v3883_v17   ;;  %v2320_v29 = vadd.f32 %v4868_v53, %v2187_v19  ;;  %v2188_v31 = vmul.f32 %v4857_v43, %v4179_v27  ;;  %v2254_v34 = vadd.f32 %v4868_v53, %v2121_v24  ;;  %v2318_v35 = vadd.f32 %v4868_v53, %v2185_v25 }
 0x177   : > { %3930 = vst [vmem:[%s4616_s9 + $0xd0] sm:$0xff] %v3718_v22   ;;  %3962 = vst [vmem:[%s4616_s9 + $0x1d0] sm:$0xff] %v3878_v23   ;;  %v2122_v36 = vmul.f32 %v4857_v43, %v1389_v32  ;;  %v2186_v37 = vmul.f32 %v4857_v43, %v1645_v33  ;;  %v2257_v38 = vadd.f32 %v4868_v53, %v2124_v30  ;;  %v2384_v41 = vmax.f32 %v2256_v28, 0.0 }
 0x178   : > { %v2321_v39 = vadd.f32 %v4868_v53, %v2188_v31  ;;  %v2448_v42 = vmax.f32 %v2320_v29, 0.0  ;;  %v2382_v45 = vmax.f32 %v2254_v34, 0.0  ;;  %v2446_v46 = vmax.f32 %v2318_v35, 0.0 }
 0x179   : > { %v2255_v40 = vadd.f32 %v4868_v53, %v2122_v36  ;;  %v2319_v8 = vadd.f32 %v4868_v53, %v2186_v37  ;;  %v2385_v10 = vmax.f32 %v2257_v38, 0.0 }
 0x17a   : > { %v2449_v44 = vmax.f32 %v2321_v39, 0.0  ;;  %v4118_v49 = vpop.f32.mrb[60].mxu0  ;;  %v4182_v50 = vpop.f32.mrb[60].mxu1 }
 0x17b   : > { %v2383_v47 = vmax.f32 %v2255_v40, 0.0  ;;  %v2447_v48 = vmax.f32 %v2319_v8, 0.0  ;;  %v3733_v51 = vpack.c.bf16 %v2385_v10, %v2384_v41  ;;  %v2127_v54 = vmul.f32 %v4857_v43, %v4118_v49  ;;  %v1402_v56 = vpop.f32.mrb[61].mxu0  ;;  %v1658_v57 = vpop.f32.mrb[61].mxu1 }
 0x17c   : > { %v3893_v52 = vpack.c.bf16 %v2449_v44, %v2448_v42  ;;  %v2191_v55 = vmul.f32 %v4857_v43, %v4182_v50  ;;  %v2125_v60 = vmul.f32 %v4857_v43, %v1402_v56  ;;  %v2189_v61 = vmul.f32 %v4857_v43, %v1658_v57  ;;  %v4119_v62 = vpop.f32.mrb[62].mxu0  ;;  %v4183_v63 = vpop.f32.mrb[62].mxu1 }
 0x17d   : > { %v3728_v58 = vpack.c.bf16 %v2383_v47, %v2382_v45  ;;  %v3888_v59 = vpack.c.bf16 %v2447_v48, %v2446_v46  ;;  %3933 = vst [vmem:[%s4616_s9 + $0xe8] sm:$0xff] %v3733_v51   ;;  %v2260_v0 = vadd.f32 %v4868_v53, %v2127_v54  ;;  %v2128_v2 = vmul.f32 %v4857_v43, %v4119_v62  ;;  %v1405_v4 = vpop.f32.mrb[63].mxu0  ;;  %v1661_v5 = vpop.f32.mrb[63].mxu1 }
 0x17e   : > { %3965 = vst [vmem:[%s4616_s9 + $0x1e8] sm:$0xff] %v3893_v52   ;;  %v2324_v1 = vadd.f32 %v4868_v53, %v2191_v55  ;;  %v2192_v3 = vmul.f32 %v4857_v43, %v4183_v63  ;;  %v2258_v6 = vadd.f32 %v4868_v53, %v2125_v60  ;;  %v2322_v7 = vadd.f32 %v4868_v53, %v2189_v61 }
 0x17f   : > { %3932 = vst [vmem:[%s4616_s9 + $0xe0] sm:$0xff] %v3728_v58   ;;  %3964 = vst [vmem:[%s4616_s9 + $0x1e0] sm:$0xff] %v3888_v59   ;;  %v2126_v9 = vmul.f32 %v4857_v43, %v1405_v4  ;;  %v2190_v11 = vmul.f32 %v4857_v43, %v1661_v5  ;;  %v2261_v12 = vadd.f32 %v4868_v53, %v2128_v2  ;;  %v2388_v16 = vmax.f32 %v2260_v0, 0.0 }
 0x180   : > { %v2325_v13 = vadd.f32 %v4868_v53, %v2192_v3  ;;  %v2452_v17 = vmax.f32 %v2324_v1, 0.0  ;;  %v2386_v43 = vmax.f32 %v2258_v6, 0.0  ;;  %v2450_v20 = vmax.f32 %v2322_v7, 0.0 }
 0x181   : > { %v2259_v14 = vadd.f32 %v4868_v53, %v2126_v9  ;;  %v2323_v15 = vadd.f32 %v4868_v53, %v2190_v11  ;;  %v2389_v18 = vmax.f32 %v2261_v12, 0.0 }
 0x182   : > { %v2453_v19 = vmax.f32 %v2325_v13, 0.0 }
 0x183   : > { %v2387_v21 = vmax.f32 %v2259_v14, 0.0  ;;  %v2451_v22 = vmax.f32 %v2323_v15, 0.0  ;;  %v3743_v23 = vpack.c.bf16 %v2389_v18, %v2388_v16 }
 0x184   : > { %v3903_v24 = vpack.c.bf16 %v2453_v19, %v2452_v17 }
 0x185   : > { %v3738_v53 = vpack.c.bf16 %v2387_v21, %v2386_v43  ;;  %v3898_v25 = vpack.c.bf16 %v2451_v22, %v2450_v20  ;;  %3935 = vst [vmem:[%s4616_s9 + $0xf8] sm:$0xff] %v3743_v23  }
 0x186   : > { %3967 = vst [vmem:[%s4616_s9 + $0x1f8] sm:$0xff] %v3903_v24  }
 0x187   : > { %3934 = vst [vmem:[%s4616_s9 + $0xf0] sm:$0xff] %v3738_v53   ;;  %3966 = vst [vmem:[%s4616_s9 + $0x1f0] sm:$0xff] %v3898_v25  }
 0x188   : > { %4344 = shalt.err (!%p4341_p5)
}
 0x189   : > { %s4345_s6 = scalar_lea.hbm %s4929_s15, 8192  ;;  %s4349_s9 = scalar_lea.hbm %s4988_s3, 16384 }
 0x18a   : > { %p4346_p6 = scmp.ne.s32.totalorder %s4929_s15, %s4345_s6  ;;  %p4350_p10 = scmp.lt.u32.totalorder %s4929_s15, %s4988_s3 }
 0x18b   : > { %p4351_p11 = scmp.lt.u32.totalorder %s4349_s9, %s4345_s6  ;;  %p4353_p13 = scmp.lt.u32.totalorder %s4345_s6, %s4929_s15 }
 0x18c   : > { %p4347_p7 = pnand %p4346_p6, %p4474_p4 }
 0x18d   : > { %p4352_p12 = por %p4351_p11, %p4350_p10 }
 0x18e   : > { %p4348_p9 = pneg %p4347_p7 }
 0x18f   : > { %p4354_p0 = por %p4353_p13, %p4352_p12 }
 0x191   : > { %p4355_p1 = pnand %p4354_p0, %p4348_p9 }
 0x193   : > { %4358 = shalt.err (!%p4355_p1)
}
 0x194   : > { %s4412_s18 = smov 64   ;;  %s4413_s19 = smov 4  }
 0x195   : > { %4200 = dma.vmem_to_hbm [thread:$0]  (%p4474_p4), %s4931_s23, 8192, %s4929_s15, %s4939_s28, %s4412_s18, %s4412_s18, %s4413_s19  }
 0x196 PF: > { %p4206_p2 = scmp.ge.s32.totalorder %s4409_s17, 2  ;;  %s3126_s21 = sand.u32 1, %s4389_s12  }
 0x197   : > { %s3127_s26 = scalar_lea.sflag [#allocation4], %s3126_s21 }
 0x198   : > { %p4203_p3 = pnand %p4206_p2, %p4481_p8 }
 0x19a   : > { %4384 = dma.done.wait (!%p4203_p3), %s3127_s26, 8192  }
 0x19b   : > { %4386 = vsyncadd (!%p4203_p3), %s3127_s26, 4294959104  ;;  %s16_s17 = sadd.s32 1, %s4409_s17   ;;  %s4991_s12 = smov %s4393_s13 }
 0x19c   : > { %p13_p5 = scmp.ge.s32.totalorder %s16_s17, 4   ;;  %s4992_s13 = smov %s4397_s14 }
 0x19d   : > { %s4993_s14 = smov %s4487_s25  ;;  %s4994_s15 = smov %s4405_s16 }
 0x19e   : > { %s4995_s16 = smov %s4997_s20  ;;  %15 = sbr.rel (!%p13_p5) target bundleno = 4 (0x4), region = 81 }
 0x1a5   :  { %3132 = vsyncpa [#allocation4], 1 }
 0x1a6   :  { %3134 = vsyncpa [#allocation4 + $0x1], 1 }

</bundles_post_ra>
